<compile_context>
chip_gen: v7x
topology: tpu7x:2x2x1
jax: 0.10.0
libtpu: 0.0.40
codegen_flags: <defaults>
</compile_context>

<pallas_src>
import functools

import numpy as np
import jax
import jax.numpy as jnp
from jax.experimental import pallas as pl
from jax.experimental.pallas import tpu as pltpu


# ----------------------------- config (synthetic) -----------------------------
NUM_KV_HEADS = 4
HEAD_DIM = 16                      # per-head key/value dim
ROPE_PER_HEAD = 8                  # dims that carry RoPE (the "~nope" part)
NOPE_PER_HEAD = HEAD_DIM - ROPE_PER_HEAD
LOW_RANK = 8
ACTIVATION_FN = "silu"             # config.AE['activation_fn']

FULL_DIM = NUM_KV_HEADS * HEAD_DIM           # nope_mask.shape[-1]  = 64
NOPE_DIM = NUM_KV_HEADS * NOPE_PER_HEAD      # nope_mask.sum()      = 32
ROPE_DIM = FULL_DIM - NOPE_DIM               #                      = 32
LATENT_DIM = LOW_RANK * NUM_KV_HEADS         #                      = 32


def apply_activation(x, name):
    if name == "silu":
        return x * jax.nn.sigmoid(x)
    if name == "relu":
        return jnp.maximum(x, 0.0)
    if name in (None, "identity", "none"):
        return x
    raise ValueError(f"unknown activation {name}")


# --------------------------- weight packing (once) -----------------------------
def pack_autoencoder_params(params, nope_mask, param_dtype=jnp.float32):
    """Fold the scatter matrices into the projection weights (f32, cast once).

    Returns packed weights so the kernel needs only 4 matmuls:
      c   = k_nope @ wdk_pad + value @ wdv_pad            (block-diag down-proj)
      out = act(c) @ w_up                                  (key | value slab)
      key = out[:, :full] + k_r @ s_rope  ;  val = out[:, full:]
    """
    mask = np.asarray(nope_mask, dtype=bool)
    full_dim = mask.shape[-1]
    nope_idx = np.nonzero(mask)[0]
    rope_idx = np.nonzero(~mask)[0]
    nope_dim = int(nope_idx.size)
    rope_dim = int(rope_idx.size)

    wdk = jnp.asarray(params["W_down_k"], jnp.float32)   # (latent, nope)  PyTorch (out,in)
    wdv = jnp.asarray(params["W_down_v"], jnp.float32)   # (latent, full)
    wuk = jnp.asarray(params["W_up_k"],  jnp.float32)    # (nope, latent)
    wuv = jnp.asarray(params["W_up_v"],  jnp.float32)    # (full, latent)
    latent = wdk.shape[0]

    # Fused block-diagonal down-projection, split into two zero-padded halves:
    #   [c_k | c_v] = k_nope @ wdk_pad + value @ wdv_pad   (padded terms are exact 0.0)
    wdk_pad = jnp.zeros((nope_dim, 2 * latent), jnp.float32).at[:, :latent].set(wdk.T)
    wdv_pad = jnp.zeros((full_dim, 2 * latent), jnp.float32).at[:, latent:].set(wdv.T)

    # Fused up-projection with the nope-scatter folded in (pure index placement,
    # exact): columns [0, full) are the key, columns [full, 2*full) are v_o.
    w_up = jnp.zeros((2 * latent, 2 * full_dim), jnp.float32)
    w_up = w_up.at[:latent, nope_idx].set(wuk.T)          # key (nope columns)
    w_up = w_up.at[latent:, full_dim:].set(wuv.T)         # value columns

    # Exact 0/1 scatter of k_r into the rope columns of the key half only.
    s_rope = np.zeros((rope_dim, full_dim), np.float32)
    s_rope[np.arange(rope_dim), rope_idx] = 1.0

    return {
        "wdk_pad": wdk_pad.astype(param_dtype),
        "wdv_pad": wdv_pad.astype(param_dtype),
        "w_up":    w_up.astype(param_dtype),
        "s_rope":  jnp.asarray(s_rope, param_dtype),
    }


# --------------------------------- kernel -------------------------------------
def _ae_kernel(k_nope_ref, v_ref, k_r_ref,
               wdk_ref, wdv_ref, wup_ref, srope_ref,
               key_ref, val_ref, *, full_dim):
    # Fused down-projection (block-diagonal weight as sum of two zero-padded dots).
    c = (jnp.dot(k_nope_ref[...], wdk_ref[...], preferred_element_type=jnp.float32)
         + jnp.dot(v_ref[...],    wdv_ref[...], preferred_element_type=jnp.float32))
    c = apply_activation(c, ACTIVATION_FN)                 # f32 on all generations

    # Fused up-projection (nope scatter pre-folded) -> lane-dense [key | v_o] slab.
    # Intentional: on bf16 weights the latent is rounded to bf16 for a single-pass
    # native-MXU dot (no mixed f32 x bf16).
    out = jnp.dot(c.astype(wup_ref.dtype), wup_ref[...],
                  preferred_element_type=jnp.float32)

    # Key half gets the exact 0/1 scatter of k_r into its rope columns; value half
    # is the right lanes of the slab.  The lane slices stay in vregs (XLU slot).
    key = out[:, :full_dim] + jnp.dot(k_r_ref[...], srope_ref[...],
                                      preferred_element_type=jnp.float32)
    val = out[:, full_dim:]

    key_ref[...] = key.astype(key_ref.dtype)
    val_ref[...] = val.astype(val_ref.dtype)


def _pick_bm(M, block_m, min_tile=16):
    """Row tile: multiple of 16 (f32/bf16 sublane packing), capped at 2048 for
    v7x VMEM, and chosen so the grid has >= 2 steps whenever M > 16 so the
    'parallel' axis can shard across both v7x TensorCores."""
    bm = max(min_tile, min(int(block_m), 2048))
    bm = (bm // min_tile) * min_tile
    if M <= min_tile:
        return M                       # tiny input: single block == full extent
    if bm >= M:
        half = (M + 1) // 2
        bm = ((half + min_tile - 1) // min_tile) * min_tile
    return bm


@functools.partial(jax.jit, static_argnames=("block_m",))
def auto_encoder_v1_forward(k_r, k_nope, value_states, packed, block_m=1024):
    """k_r: (B,L,rope); k_nope: (B,L,nope); value_states: (B,L,full);
    packed: see pack_autoencoder_params.  Returns (key_states, value_states)."""
    B, L, nope_dim = k_nope.shape
    rope_dim = k_r.shape[-1]
    full_dim = value_states.shape[-1]
    lat2, out_dim = packed["w_up"].shape          # (2*latent, 2*full)
    M = B * L
    dtype = k_nope.dtype

    bm = _pick_bm(M, block_m)
    grid = (pl.cdiv(M, bm),)

    k_nope2 = k_nope.reshape(M, nope_dim)
    v2 = value_states.reshape(M, full_dim)
    k_r2 = k_r.reshape(M, rope_dim)

    row = lambda d: pl.BlockSpec((bm, d), lambda i: (i, 0))
    whole = lambda r, c: pl.BlockSpec((r, c), lambda i: (0, 0))

    # Advisory cost hint so XLA can overlap the surrounding graph with this op.
    itemsize = jnp.dtype(dtype).itemsize
    flops = 2 * M * (nope_dim * lat2 + full_dim * lat2
                     + lat2 * out_dim + rope_dim * full_dim)
    w_bytes = sum(int(np.prod(w.shape)) * jnp.dtype(w.dtype).itemsize
                  for w in packed.values())
    bytes_accessed = itemsize * M * (nope_dim + full_dim + rope_dim + 2 * full_dim) + w_bytes
    cost = pl.CostEstimate(flops=int(flops),
                           transcendentals=int(M * lat2),
                           bytes_accessed=int(bytes_accessed))

    key2, val2 = pl.pallas_call(
        functools.partial(_ae_kernel, full_dim=full_dim),
        out_shape=(jax.ShapeDtypeStruct((M, full_dim), dtype),
                   jax.ShapeDtypeStruct((M, full_dim), dtype)),
        grid_spec=pltpu.PrefetchScalarGridSpec(
            num_scalar_prefetch=0,
            grid=grid,
            in_specs=[
                row(nope_dim),                 # k_nope  (streamed)
                row(full_dim),                 # value   (streamed)
                row(rope_dim),                 # k_r     (streamed)
                whole(nope_dim, lat2),         # W_down_k (padded)   - fetched once
                whole(full_dim, lat2),         # W_down_v (padded)   - fetched once
                whole(lat2, out_dim),          # fused up weight     - fetched once
                whole(rope_dim, full_dim),     # rope scatter        - fetched once
            ],
            out_specs=[
                row(full_dim),                 # key_states (64-lane masked stores,
                row(full_dim),                 # value_states   cheaper than an XLA split)
            ],
        ),
        compiler_params=pltpu.CompilerParams(
            dimension_semantics=("parallel",)),
        cost_estimate=cost,
    )(k_nope2, v2, k_r2,
      packed["wdk_pad"], packed["wdv_pad"], packed["w_up"], packed["s_rope"])

    return key2.reshape(B, L, full_dim), val2.reshape(B, L, full_dim)


# ------------------------------- reference ------------------------------------
def _reference(k_r, k_nope, value_states, params, nope_mask):
    k_r = k_r.astype(jnp.float32)
    k_nope = k_nope.astype(jnp.float32)
    value_states = value_states.astype(jnp.float32)
    c_k = apply_activation(k_nope @ params["W_down_k"].T, ACTIVATION_FN)
    c_v = apply_activation(value_states @ params["W_down_v"].T, ACTIVATION_FN)
    k_c = c_k @ params["W_up_k"].T
    v_o = c_v @ params["W_up_v"].T
    mask = np.asarray(nope_mask, dtype=bool)
    nope_idx = np.nonzero(mask)[0]
    rope_idx = np.nonzero(~mask)[0]
    B, L, _ = k_nope.shape
    key = jnp.zeros((B, L, mask.shape[-1]), jnp.float32)
    key = key.at[..., nope_idx].set(k_c)
    key = key.at[..., rope_idx].set(k_r)
    return key, v_o


# --------------------------------- main ---------------------------------------
if __name__ == "__main__":
    B, L = 2, 512          # M = 1024 rows -> default block_m gives a 2-step grid
    key0 = jax.random.PRNGKey(0)
    ks = jax.random.split(key0, 8)

    # nope_mask: per head, first NOPE_PER_HEAD dims are "nope", rest carry RoPE
    nope_mask = np.tile(
        np.concatenate([np.ones(NOPE_PER_HEAD, bool), np.zeros(ROPE_PER_HEAD, bool)]),
        NUM_KV_HEADS)

    # deterministic synthetic parameters (PyTorch Linear layout: (out, in))
    scale = 0.05
    params = {
        "W_down_k": scale * jax.random.normal(ks[0], (LATENT_DIM, NOPE_DIM), jnp.float32),
        "W_down_v": scale * jax.random.normal(ks[1], (LATENT_DIM, FULL_DIM), jnp.float32),
        "W_up_k":   scale * jax.random.normal(ks[2], (NOPE_DIM, LATENT_DIM), jnp.float32),
        "W_up_v":   scale * jax.random.normal(ks[3], (FULL_DIM, LATENT_DIM), jnp.float32),
    }

    k_r = jax.random.normal(ks[4], (B, L, ROPE_DIM), jnp.float32)
    k_nope = jax.random.normal(ks[5], (B, L, NOPE_DIM), jnp.float32)
    value_states = jax.random.normal(ks[6], (B, L, FULL_DIM), jnp.float32)

    # ---- f32 path (exact against reference) ----
    packed_f32 = pack_autoencoder_params(params, nope_mask, jnp.float32)
    key_out, val_out = auto_encoder_v1_forward(k_r, k_nope, value_states, packed_f32)
    jax.block_until_ready((key_out, val_out))

    key_ref, val_ref = _reference(k_r, k_nope, value_states, params, nope_mask)
    assert key_out.shape == (B, L, FULL_DIM) and val_out.shape == (B, L, FULL_DIM)
    assert jnp.allclose(key_out, key_ref, atol=1e-5, rtol=1e-5)
    assert jnp.allclose(val_out, val_ref, atol=1e-5, rtol=1e-5)

    # ---- bf16 I/O path (production default: halves HBM traffic; f32 accumulation) ----
    packed_bf16 = pack_autoencoder_params(params, nope_mask, jnp.bfloat16)
    k_r_b = k_r.astype(jnp.bfloat16)
    k_nope_b = k_nope.astype(jnp.bfloat16)
    value_b = value_states.astype(jnp.bfloat16)
    key_b, val_b = auto_encoder_v1_forward(k_r_b, k_nope_b, value_b, packed_bf16)
    jax.block_until_ready((key_b, val_b))
    key_ref_b, val_ref_b = _reference(k_r_b, k_nope_b, value_b, params, nope_mask)
    assert key_b.dtype == jnp.bfloat16 and val_b.dtype == jnp.bfloat16
    assert jnp.allclose(key_b.astype(jnp.float32), key_ref_b, atol=5e-2, rtol=5e-2)
    assert jnp.allclose(val_b.astype(jnp.float32), val_ref_b, atol=5e-2, rtol=5e-2)

    print("KERNEL_OK")
</pallas_src>

<mosaic_0001>
module attributes {stable_mosaic.version = 11 : i64} {
  func.func @_ae_kernel(%arg0: i32, %arg1: memref<512x32xf32, #tpu.memory_space<vmem>>, %arg2: memref<512x64xf32, #tpu.memory_space<vmem>>, %arg3: memref<512x32xf32, #tpu.memory_space<vmem>>, %arg4: memref<32x64xf32, #tpu.memory_space<vmem>>, %arg5: memref<64x64xf32, #tpu.memory_space<vmem>>, %arg6: memref<64x128xf32, #tpu.memory_space<vmem>>, %arg7: memref<32x64xf32, #tpu.memory_space<vmem>>, %arg8: memref<512x64xf32, #tpu.memory_space<vmem>>, %arg9: memref<512x64xf32, #tpu.memory_space<vmem>>) attributes {dimension_semantics = [#tpu.dimension_semantics<parallel>], iteration_bounds = array<i64: 2>, scalar_prefetch = 0 : i64, scratch_operands = 0 : i64, tpu.core_type = #tpu.core_type<tc>, window_params = [{transform_indices = @transform_0, window_bounds = array<i64: 512, 32>}, {transform_indices = @transform_1, window_bounds = array<i64: 512, 64>}, {transform_indices = @transform_2, window_bounds = array<i64: 512, 32>}, {pipeline_mode = #tpu.pipeline_mode<synchronous>, transform_indices = @transform_3, window_bounds = array<i64: 32, 64>}, {pipeline_mode = #tpu.pipeline_mode<synchronous>, transform_indices = @transform_4, window_bounds = array<i64: 64, 64>}, {pipeline_mode = #tpu.pipeline_mode<synchronous>, transform_indices = @transform_5, window_bounds = array<i64: 64, 128>}, {pipeline_mode = #tpu.pipeline_mode<synchronous>, transform_indices = @transform_6, window_bounds = array<i64: 32, 64>}, {transform_indices = @transform_7, window_bounds = array<i64: 512, 64>}, {transform_indices = @transform_8, window_bounds = array<i64: 512, 64>}]} {
    %c0 = arith.constant 0 : index
    %c0_0 = arith.constant 0 : index
    %0 = vector.load %arg1[%c0, %c0_0] : memref<512x32xf32, #tpu.memory_space<vmem>>, vector<512x32xf32>
    %c0_1 = arith.constant 0 : index
    %c0_2 = arith.constant 0 : index
    %1 = vector.load %arg4[%c0_1, %c0_2] : memref<32x64xf32, #tpu.memory_space<vmem>>, vector<32x64xf32>
    %cst = arith.constant dense<0.000000e+00> : vector<512x64xf32>
    %2 = tpu.matmul %0, %1, %cst {dimension_numbers = #tpu.dot_dimension_numbers<[1], [0], [0], [1], [0, 0, 1, 1], [], []>} : vector<512x32xf32>, vector<32x64xf32>, vector<512x64xf32> -> vector<512x64xf32>
    %c0_3 = arith.constant 0 : index
    %c0_4 = arith.constant 0 : index
    %3 = vector.load %arg2[%c0_3, %c0_4] : memref<512x64xf32, #tpu.memory_space<vmem>>, vector<512x64xf32>
    %c0_5 = arith.constant 0 : index
    %c0_6 = arith.constant 0 : index
    %4 = vector.load %arg5[%c0_5, %c0_6] : memref<64x64xf32, #tpu.memory_space<vmem>>, vector<64x64xf32>
    %cst_7 = arith.constant dense<0.000000e+00> : vector<512x64xf32>
    %5 = tpu.matmul %3, %4, %cst_7 {dimension_numbers = #tpu.dot_dimension_numbers<[1], [0], [0], [1], [0, 0, 1, 1], [], []>} : vector<512x64xf32>, vector<64x64xf32>, vector<512x64xf32> -> vector<512x64xf32>
    %6 = arith.addf %2, %5 : vector<512x64xf32>
    %7 = arith.negf %6 : vector<512x64xf32>
    %8 = math.exp %7 : vector<512x64xf32>
    %cst_8 = arith.constant 1.000000e+00 : f32
    %9 = vector.broadcast %cst_8 : f32 to vector<512x64xf32>
    %10 = arith.addf %9, %8 : vector<512x64xf32>
    %11 = arith.divf %9, %10 : vector<512x64xf32>
    %12 = arith.mulf %6, %11 : vector<512x64xf32>
    %c0_9 = arith.constant 0 : index
    %c0_10 = arith.constant 0 : index
    %13 = vector.load %arg6[%c0_9, %c0_10] : memref<64x128xf32, #tpu.memory_space<vmem>>, vector<64x128xf32>
    %cst_11 = arith.constant dense<0.000000e+00> : vector<512x128xf32>
    %14 = tpu.matmul %12, %13, %cst_11 {dimension_numbers = #tpu.dot_dimension_numbers<[1], [0], [0], [1], [0, 0, 1, 1], [], []>} : vector<512x64xf32>, vector<64x128xf32>, vector<512x128xf32> -> vector<512x128xf32>
    %15 = vector.extract_strided_slice %14 {offsets = [0, 0], sizes = [512, 64], strides = [1, 1]} : vector<512x128xf32> to vector<512x64xf32>
    %c0_12 = arith.constant 0 : index
    %c0_13 = arith.constant 0 : index
    %16 = vector.load %arg3[%c0_12, %c0_13] : memref<512x32xf32, #tpu.memory_space<vmem>>, vector<512x32xf32>
    %c0_14 = arith.constant 0 : index
    %c0_15 = arith.constant 0 : index
    %17 = vector.load %arg7[%c0_14, %c0_15] : memref<32x64xf32, #tpu.memory_space<vmem>>, vector<32x64xf32>
    %cst_16 = arith.constant dense<0.000000e+00> : vector<512x64xf32>
    %18 = tpu.matmul %16, %17, %cst_16 {dimension_numbers = #tpu.dot_dimension_numbers<[1], [0], [0], [1], [0, 0, 1, 1], [], []>} : vector<512x32xf32>, vector<32x64xf32>, vector<512x64xf32> -> vector<512x64xf32>
    %19 = arith.addf %15, %18 : vector<512x64xf32>
    %20 = vector.extract_strided_slice %14 {offsets = [0, 64], sizes = [512, 64], strides = [1, 1]} : vector<512x128xf32> to vector<512x64xf32>
    %c0_17 = arith.constant 0 : index
    %c0_18 = arith.constant 0 : index
    %21 = vector.load %arg8[%c0_17, %c0_18] : memref<512x64xf32, #tpu.memory_space<vmem>>, vector<512x64xf32>
    tpu.vector_store %arg8[%c0_17, %c0_18], %19 {strides = array<i32>} : memref<512x64xf32, #tpu.memory_space<vmem>>, vector<512x64xf32>,
    %c0_19 = arith.constant 0 : index
    %c0_20 = arith.constant 0 : index
    %22 = vector.load %arg9[%c0_19, %c0_20] : memref<512x64xf32, #tpu.memory_space<vmem>>, vector<512x64xf32>
    tpu.vector_store %arg9[%c0_19, %c0_20], %20 {strides = array<i32>} : memref<512x64xf32, #tpu.memory_space<vmem>>, vector<512x64xf32>,
    return
  }
  func.func @transform_0(%arg0: i32) -> (i32, i32) {
    %c0_i32 = arith.constant 0 : i32
    %c0_i32_0 = arith.constant 0 : i32
    return %arg0, %c0_i32 : i32, i32
  }
  func.func @transform_1(%arg0: i32) -> (i32, i32) {
    %c0_i32 = arith.constant 0 : i32
    %c0_i32_0 = arith.constant 0 : i32
    return %arg0, %c0_i32 : i32, i32
  }
  func.func @transform_2(%arg0: i32) -> (i32, i32) {
    %c0_i32 = arith.constant 0 : i32
    %c0_i32_0 = arith.constant 0 : i32
    return %arg0, %c0_i32 : i32, i32
  }
  func.func @transform_3(%arg0: i32) -> (i32, i32) {
    %c0_i32 = arith.constant 0 : i32
    %c0_i32_0 = arith.constant 0 : i32
    %c0_i32_1 = arith.constant 0 : i32
    return %c0_i32, %c0_i32_0 : i32, i32
  }
  func.func @transform_4(%arg0: i32) -> (i32, i32) {
    %c0_i32 = arith.constant 0 : i32
    %c0_i32_0 = arith.constant 0 : i32
    %c0_i32_1 = arith.constant 0 : i32
    return %c0_i32, %c0_i32_0 : i32, i32
  }
  func.func @transform_5(%arg0: i32) -> (i32, i32) {
    %c0_i32 = arith.constant 0 : i32
    %c0_i32_0 = arith.constant 0 : i32
    %c0_i32_1 = arith.constant 0 : i32
    return %c0_i32, %c0_i32_0 : i32, i32
  }
  func.func @transform_6(%arg0: i32) -> (i32, i32) {
    %c0_i32 = arith.constant 0 : i32
    %c0_i32_0 = arith.constant 0 : i32
    %c0_i32_1 = arith.constant 0 : i32
    return %c0_i32, %c0_i32_0 : i32, i32
  }
  func.func @transform_7(%arg0: i32) -> (i32, i32) {
    %c0_i32 = arith.constant 0 : i32
    %c0_i32_0 = arith.constant 0 : i32
    return %arg0, %c0_i32 : i32, i32
  }
  func.func @transform_8(%arg0: i32) -> (i32, i32) {
    %c0_i32 = arith.constant 0 : i32
    %c0_i32_0 = arith.constant 0 : i32
    return %arg0, %c0_i32 : i32, i32
  }
}

</mosaic_0001>

<bundles_post_ra>
// kernel: auto_encoder_v1_forward.1
= control target key start
LH: loop header
LB: loop body
LE: loop exit
PB: predicated region body
PF: predicated region fallthrough
CT: control target
= control target key end

     0   :  { %s5383_s27 = smov 0   ;;  %s6782_s0 = inlined_call_operand.vmem [shape: f32[1024,32], index: 0, kind: input, shape index: {}]   ;;  %s6783_s1 = inlined_call_operand.vmem [shape: f32[1024,64], index: 1, kind: input, shape index: {}]   ;;  %s6784_s2 = inlined_call_operand.vmem [shape: f32[1024,32], index: 2, kind: input, shape index: {}]   ;;  %s6785_s3 = inlined_call_operand.vmem [shape: f32[32,64], index: 3, kind: input, shape index: {}]   ;;  %s6786_s4 = inlined_call_operand.vmem [shape: f32[64,64], index: 4, kind: input, shape index: {}]   ;;  %s6787_s5 = inlined_call_operand.vmem [shape: f32[64,128], index: 5, kind: input, shape index: {}]   ;;  %s6788_s6 = inlined_call_operand.vmem [shape: f32[32,64], index: 6, kind: input, shape index: {}]   ;;  %s6789_s7 = inlined_call_operand.vmem [shape: f32[1024,64], index: 7, kind: output, shape index: {0}]   ;;  %s6790_s8 = inlined_call_operand.vmem [shape: f32[1024,64], index: 8, kind: output, shape index: {1}]  }
   0x1 LB: > { %s3903_s28 = sadd.s32 4294967295, %s5335_s27   ;;  %p3907_p0 = scmp.ge.s32.totalorder %s5335_s27, 1  ;;  %s5335_s27 = sphi %s5383_s27, %s19_s27  }
   0x2   : > { %p288_p1 = scmp.lt.s32.totalorder %s5335_s27, 3 }
   0x4   : > { %p289_p2 = pnand %p3907_p0, %p288_p1 }
   0x6   : > { %292 = sbr.rel (%p289_p2) target bundleno = 873 (0x369), region = 48 }
   0xd   : > { %v499_v0 = vld [vmem:[%s6786_s4] sm:$0xff]  ;;  %v500_v1 = vld [vmem:[%s6786_s4 + $0x8] sm:$0xff]  ;;  %v501_v2 = vld [vmem:[%s6786_s4 + $0x10] sm:$0xff]  ;;  %s3908_s13 = sshll.u32 %s3903_s28, 6  ;;  %vm507_vm0 = vcmask 523264   ;;  %vm1085_vm1 = vcmask 261120  }
   0xe   : > { %v4952_v3 = vpack.c.bf16 %v500_v1, %v499_v0  ;;  %v502_v4 = vld [vmem:[%s6786_s4 + $0x18] sm:$0xff]  ;;  %p338_p3 = scmp.lt.s32.totalorder %s3908_s13, 127  ;;  %v503_v6 = vld [vmem:[%s6786_s4 + $0x20] sm:$0xff]  ;;  %v504_v7 = vld [vmem:[%s6786_s4 + $0x28] sm:$0xff]  ;;  %s5337_s26 = smov 64  }
   0xf   : > { %v4956_v5 = vpack.c.bf16 %v502_v4, %v501_v2  ;;  %v4960_v8 = vpack.c.bf16 %v504_v7, %v503_v6  ;;  %v505_v9 = vld [vmem:[%s6786_s4 + $0x30] sm:$0xff]  ;;  %v506_v10 = vld [vmem:[%s6786_s4 + $0x38] sm:$0xff]  ;;  %v431_v13 = vld [vmem:[%s6785_s3] sm:$0xff] }
  0x10   : > { %4953 = vmatprep.subr.bf16.mxu0 %v4952_v3  ;;  %s6816_s13 = smov (!%p338_p3, %s3908_s13), 127  ;;  %v4964_v12 = vpack.c.bf16 %v506_v10, %v505_v9  ;;  %v432_v14 = vld [vmem:[%s6785_s3 + $0x8] sm:$0xff]  ;;  %v433_v16 = vld [vmem:[%s6785_s3 + $0x10] sm:$0xff]  ;;  %v434_v17 = vld [vmem:[%s6785_s3 + $0x18] sm:$0xff] }
  0x11   : > { %4955 = vmatpush3.bf16.msra.mxu0 %v4952_v3  ;;  %s5409_s20 = sshll.u32 %s6816_s13, 3  ;;  %v4968_v15 = vpack.c.bf16 %v432_v14, %v431_v13  ;;  %v4972_v20 = vpack.c.bf16 %v434_v17, %v433_v16 }
  0x12   : > { %4957 = vmatprep.subr.bf16.mxu0 %v4956_v5  ;;  %s5421_s28 = scalar_lea.vmem %s6783_s1, %s5409_s20  ;;  %s5563_s17 = scalar_lea.vmem %s6782_s0, %s5409_s20 }
  0x13   : > { %v435_v11 = vld [vmem:[%s5421_s28] sm:$0xff]  ;;  %v436_v18 = vld [vmem:[%s5421_s28 + $0x8] sm:$0xff]  ;;  %v437_v19 = vld [vmem:[%s5421_s28 + $0x10] sm:$0xff]  ;;  %s6056_s25 = scalar_lea.vmem %s6784_s2, %s5409_s20  ;;  %s6417_s30 = scalar_lea.vmem %s6790_s8, %s5409_s20 }
  0x14   : > { %4536 = vmatprep.mubr.msk.f32.mxu0 %vm507_vm0, %v435_v11  ;;  %v438_v21 = vld [vmem:[%s5421_s28 + $0x18] sm:$0xff]  ;;  %v439_v22 = vld [vmem:[%s5421_s28 + $0x20] sm:$0xff]  ;;  %v440_v23 = vld [vmem:[%s5421_s28 + $0x28] sm:$0xff]  ;;  %s6471_s11 = scalar_lea.vmem %s6789_s7, %s5409_s20 }
  0x15   : > { %4959 = vmatpush3.bf16.msra.mxu0 %v4956_v5  ;;  %v441_v24 = vld [vmem:[%s5421_s28 + $0x30] sm:$0xff]  ;;  %v442_v25 = vld [vmem:[%s5421_s28 + $0x38] sm:$0xff]  ;;  %v443_v26 = vld [vmem:[%s5421_s28 + $0x40] sm:$0xff] }
  0x16   : > { %4961 = vmatprep.subr.bf16.mxu0 %v4960_v8  ;;  %v444_v27 = vld [vmem:[%s5421_s28 + $0x48] sm:$0xff]  ;;  %v445_v28 = vld [vmem:[%s5421_s28 + $0x50] sm:$0xff]  ;;  %v446_v29 = vld [vmem:[%s5421_s28 + $0x58] sm:$0xff] }
  0x17   : > { %v447_v30 = vld [vmem:[%s5421_s28 + $0x60] sm:$0xff]  ;;  %v448_v31 = vld [vmem:[%s5421_s28 + $0x68] sm:$0xff]  ;;  %v449_v32 = vld [vmem:[%s5421_s28 + $0x70] sm:$0xff] }
  0x18   : > { %v450_v33 = vld [vmem:[%s5421_s28 + $0x78] sm:$0xff]  ;;  %v451_v34 = vld [vmem:[%s5421_s28 + $0x80] sm:$0xff]  ;;  %v452_v35 = vld [vmem:[%s5421_s28 + $0x88] sm:$0xff] }
  0x19   : > { %4963 = vmatpush3.bf16.msra.mxu0 %v4960_v8  ;;  %v453_v36 = vld [vmem:[%s5421_s28 + $0x90] sm:$0xff]  ;;  %v454_v37 = vld [vmem:[%s5421_s28 + $0x98] sm:$0xff]  ;;  %v455_v38 = vld [vmem:[%s5421_s28 + $0xa0] sm:$0xff] }
  0x1a   : > { %4965 = vmatprep.subr.bf16.mxu0 %v4964_v12  ;;  %v456_v39 = vld [vmem:[%s5421_s28 + $0xa8] sm:$0xff]  ;;  %v457_v40 = vld [vmem:[%s5421_s28 + $0xb0] sm:$0xff]  ;;  %v458_v41 = vld [vmem:[%s5421_s28 + $0xb8] sm:$0xff] }
  0x1b   : > { %v459_v42 = vld [vmem:[%s5421_s28 + $0xc0] sm:$0xff]  ;;  %v460_v43 = vld [vmem:[%s5421_s28 + $0xc8] sm:$0xff]  ;;  %v461_v44 = vld [vmem:[%s5421_s28 + $0xd0] sm:$0xff] }
  0x1c   : > { %v462_v45 = vld [vmem:[%s5421_s28 + $0xd8] sm:$0xff]  ;;  %v463_v46 = vld [vmem:[%s5421_s28 + $0xe0] sm:$0xff]  ;;  %v464_v47 = vld [vmem:[%s5421_s28 + $0xe8] sm:$0xff] }
  0x1d   : > { %4967 = vmatpush3.bf16.msra.mxu0 %v4964_v12  ;;  %v465_v48 = vld [vmem:[%s5421_s28 + $0xf0] sm:$0xff]  ;;  %v466_v49 = vld [vmem:[%s5421_s28 + $0xf8] sm:$0xff]  ;;  %v467_v50 = vld [vmem:[%s5421_s28 + $0x100] sm:$0xff] }
  0x1e   : > { %4969 = vmatprep.subr.bf16.mxu0 %v4968_v15  ;;  %v468_v51 = vld [vmem:[%s5421_s28 + $0x108] sm:$0xff]  ;;  %v469_v52 = vld [vmem:[%s5421_s28 + $0x110] sm:$0xff]  ;;  %v470_v53 = vld [vmem:[%s5421_s28 + $0x118] sm:$0xff] }
  0x1f   : > { %v471_v54 = vld [vmem:[%s5421_s28 + $0x120] sm:$0xff]  ;;  %v472_v55 = vld [vmem:[%s5421_s28 + $0x128] sm:$0xff]  ;;  %v473_v56 = vld [vmem:[%s5421_s28 + $0x130] sm:$0xff] }
  0x20   : > { %4537 = vmatmul.mubr.msk.f32.vlgmr.msra.gmra.mrb[0].mxu0 %vm507_vm0, %v436_v18  ;;  %v474_v57 = vld [vmem:[%s5421_s28 + $0x138] sm:$0xff]  ;;  %v475_v58 = vld [vmem:[%s5421_s28 + $0x140] sm:$0xff]  ;;  %v476_v59 = vld [vmem:[%s5421_s28 + $0x148] sm:$0xff] }
  0x21   : > { %4971 = vmatpush3.bf16.msra.mxu0 %v4968_v15  ;;  %4539 = vmatprep.mubr.msk.f32.mxu0 %vm507_vm0, %v437_v19  ;;  %v477_v60 = vld [vmem:[%s5421_s28 + $0x150] sm:$0xff]  ;;  %v478_v61 = vld [vmem:[%s5421_s28 + $0x158] sm:$0xff]  ;;  %v479_v62 = vld [vmem:[%s5421_s28 + $0x160] sm:$0xff] }
  0x22   : > { %4973 = vmatprep.subr.bf16.mxu0 %v4972_v20  ;;  %v480_v63 = vld [vmem:[%s5421_s28 + $0x168] sm:$0xff]  ;;  %v481_v0 = vld [vmem:[%s5421_s28 + $0x170] sm:$0xff]  ;;  %v482_v1 = vld [vmem:[%s5421_s28 + $0x178] sm:$0xff] }
  0x23   : > { %v483_v2 = vld [vmem:[%s5421_s28 + $0x180] sm:$0xff]  ;;  %v484_v3 = vld [vmem:[%s5421_s28 + $0x188] sm:$0xff]  ;;  %v485_v4 = vld [vmem:[%s5421_s28 + $0x190] sm:$0xff] }
  0x24   : > { %4540 = vmatmul.mubr.msk.f32.gmra.mrb[2].mxu0 %vm507_vm0, %v438_v21  ;;  %v486_v5 = vld [vmem:[%s5421_s28 + $0x198] sm:$0xff]  ;;  %v487_v6 = vld [vmem:[%s5421_s28 + $0x1a0] sm:$0xff]  ;;  %v488_v7 = vld [vmem:[%s5421_s28 + $0x1a8] sm:$0xff] }
  0x25   : > { %4542 = vmatprep.mubr.msk.f32.mxu0 %vm507_vm0, %v439_v22  ;;  %4975 = vmatpush3.bf16.msra.mxu0 %v4972_v20  ;;  %v489_v8 = vld [vmem:[%s5421_s28 + $0x1b0] sm:$0xff]  ;;  %v490_v9 = vld [vmem:[%s5421_s28 + $0x1b8] sm:$0xff]  ;;  %v491_v10 = vld [vmem:[%s5421_s28 + $0x1c0] sm:$0xff] }
  0x26   : > { %v492_v11 = vld [vmem:[%s5421_s28 + $0x1c8] sm:$0xff]  ;;  %v493_v12 = vld [vmem:[%s5421_s28 + $0x1d0] sm:$0xff]  ;;  %v494_v13 = vld [vmem:[%s5421_s28 + $0x1d8] sm:$0xff] }
  0x27   : > { %v495_v14 = vld [vmem:[%s5421_s28 + $0x1e0] sm:$0xff]  ;;  %v496_v15 = vld [vmem:[%s5421_s28 + $0x1e8] sm:$0xff]  ;;  %v497_v16 = vld [vmem:[%s5421_s28 + $0x1f0] sm:$0xff] }
  0x28   : > { %4543 = vmatmul.mubr.msk.f32.gmra.mrb[4].mxu0 %vm507_vm0, %v440_v23  ;;  %v498_v17 = vld [vmem:[%s5421_s28 + $0x1f8] sm:$0xff]  ;;  %v367_v18 = vld [vmem:[%s5563_s17] sm:$0xff]  ;;  %v368_v19 = vld [vmem:[%s5563_s17 + $0x8] sm:$0xff] }
  0x29   : > { %4545 = vmatprep.mubr.msk.f32.mxu0 %vm507_vm0, %v441_v24  ;;  %v369_v20 = vld [vmem:[%s5563_s17 + $0x10] sm:$0xff]  ;;  %v370_v21 = vld [vmem:[%s5563_s17 + $0x18] sm:$0xff]  ;;  %v371_v22 = vld [vmem:[%s5563_s17 + $0x20] sm:$0xff] }
  0x2a   : > { %v372_v23 = vld [vmem:[%s5563_s17 + $0x28] sm:$0xff]  ;;  %v373_v24 = vld [vmem:[%s5563_s17 + $0x30] sm:$0xff] }
  0x2c   : > { %4546 = vmatmul.mubr.msk.f32.gmra.mrb[6].mxu0 %vm507_vm0, %v442_v25  ;;  %v374_v25 = vld [vmem:[%s5563_s17 + $0x38] sm:$0xff] }
  0x2d   : > { %4548 = vmatprep.mubr.msk.f32.mxu0 %vm507_vm0, %v443_v26  ;;  %v375_v26 = vld [vmem:[%s5563_s17 + $0x40] sm:$0xff] }
  0x30   : > { %4549 = vmatmul.mubr.msk.f32.gmra.mrb[8].mxu0 %vm507_vm0, %v444_v27  ;;  %v376_v27 = vld [vmem:[%s5563_s17 + $0x48] sm:$0xff] }
  0x31   : > { %4551 = vmatprep.mubr.msk.f32.mxu0 %vm507_vm0, %v445_v28  ;;  %v377_v28 = vld [vmem:[%s5563_s17 + $0x50] sm:$0xff] }
  0x34   : > { %4552 = vmatmul.mubr.msk.f32.gmra.mrb[10].mxu0 %vm507_vm0, %v446_v29  ;;  %v378_v29 = vld [vmem:[%s5563_s17 + $0x58] sm:$0xff] }
  0x35   : > { %4554 = vmatprep.mubr.msk.f32.mxu0 %vm507_vm0, %v447_v30  ;;  %v379_v30 = vld [vmem:[%s5563_s17 + $0x60] sm:$0xff] }
  0x38   : > { %4555 = vmatmul.mubr.msk.f32.gmra.mrb[12].mxu0 %vm507_vm0, %v448_v31  ;;  %v380_v31 = vld [vmem:[%s5563_s17 + $0x68] sm:$0xff] }
  0x39   : > { %4557 = vmatprep.mubr.msk.f32.mxu0 %vm507_vm0, %v449_v32  ;;  %v381_v32 = vld [vmem:[%s5563_s17 + $0x70] sm:$0xff] }
  0x3c   : > { %4558 = vmatmul.mubr.msk.f32.gmra.mrb[14].mxu0 %vm507_vm0, %v450_v33  ;;  %v382_v33 = vld [vmem:[%s5563_s17 + $0x78] sm:$0xff] }
  0x3d   : > { %4560 = vmatprep.mubr.msk.f32.mxu0 %vm507_vm0, %v451_v34  ;;  %v383_v34 = vld [vmem:[%s5563_s17 + $0x80] sm:$0xff] }
  0x40   : > { %4561 = vmatmul.mubr.msk.f32.gmra.mrb[16].mxu0 %vm507_vm0, %v452_v35  ;;  %v384_v35 = vld [vmem:[%s5563_s17 + $0x88] sm:$0xff] }
  0x41   : > { %4563 = vmatprep.mubr.msk.f32.mxu0 %vm507_vm0, %v453_v36  ;;  %v385_v36 = vld [vmem:[%s5563_s17 + $0x90] sm:$0xff] }
  0x44   : > { %4564 = vmatmul.mubr.msk.f32.gmra.mrb[18].mxu0 %vm507_vm0, %v454_v37  ;;  %v386_v37 = vld [vmem:[%s5563_s17 + $0x98] sm:$0xff] }
  0x45   : > { %4566 = vmatprep.mubr.msk.f32.mxu0 %vm507_vm0, %v455_v38  ;;  %v387_v38 = vld [vmem:[%s5563_s17 + $0xa0] sm:$0xff] }
  0x48   : > { %4567 = vmatmul.mubr.msk.f32.gmra.mrb[20].mxu0 %vm507_vm0, %v456_v39  ;;  %v388_v39 = vld [vmem:[%s5563_s17 + $0xa8] sm:$0xff] }
  0x49   : > { %4569 = vmatprep.mubr.msk.f32.mxu0 %vm507_vm0, %v457_v40  ;;  %v389_v40 = vld [vmem:[%s5563_s17 + $0xb0] sm:$0xff] }
  0x4c   : > { %4570 = vmatmul.mubr.msk.f32.gmra.mrb[22].mxu0 %vm507_vm0, %v458_v41  ;;  %v390_v41 = vld [vmem:[%s5563_s17 + $0xb8] sm:$0xff] }
  0x4d   : > { %4572 = vmatprep.mubr.msk.f32.mxu0 %vm507_vm0, %v459_v42  ;;  %v391_v42 = vld [vmem:[%s5563_s17 + $0xc0] sm:$0xff] }
  0x50   : > { %4573 = vmatmul.mubr.msk.f32.gmra.mrb[24].mxu0 %vm507_vm0, %v460_v43  ;;  %v392_v43 = vld [vmem:[%s5563_s17 + $0xc8] sm:$0xff] }
  0x51   : > { %4575 = vmatprep.mubr.msk.f32.mxu0 %vm507_vm0, %v461_v44  ;;  %v393_v44 = vld [vmem:[%s5563_s17 + $0xd0] sm:$0xff] }
  0x54   : > { %4576 = vmatmul.mubr.msk.f32.gmra.mrb[26].mxu0 %vm507_vm0, %v462_v45  ;;  %v394_v45 = vld [vmem:[%s5563_s17 + $0xd8] sm:$0xff] }
  0x55   : > { %4578 = vmatprep.mubr.msk.f32.mxu0 %vm507_vm0, %v463_v46  ;;  %v395_v46 = vld [vmem:[%s5563_s17 + $0xe0] sm:$0xff] }
  0x58   : > { %4579 = vmatmul.mubr.msk.f32.gmra.mrb[28].mxu0 %vm507_vm0, %v464_v47  ;;  %v396_v47 = vld [vmem:[%s5563_s17 + $0xe8] sm:$0xff] }
  0x59   : > { %4581 = vmatprep.mubr.msk.f32.mxu0 %vm507_vm0, %v465_v48  ;;  %v397_v48 = vld [vmem:[%s5563_s17 + $0xf0] sm:$0xff] }
  0x5c   : > { %4582 = vmatmul.mubr.msk.f32.gmra.mrb[30].mxu0 %vm507_vm0, %v466_v49  ;;  %v398_v49 = vld [vmem:[%s5563_s17 + $0xf8] sm:$0xff] }
  0x5d   : > { %4584 = vmatprep.mubr.msk.f32.mxu0 %vm507_vm0, %v467_v50  ;;  %v399_v50 = vld [vmem:[%s5563_s17 + $0x100] sm:$0xff] }
  0x60   : > { %4585 = vmatmul.mubr.msk.f32.gmra.mrb[32].mxu0 %vm507_vm0, %v468_v51  ;;  %v400_v51 = vld [vmem:[%s5563_s17 + $0x108] sm:$0xff] }
  0x61   : > { %4587 = vmatprep.mubr.msk.f32.mxu0 %vm507_vm0, %v469_v52  ;;  %v401_v52 = vld [vmem:[%s5563_s17 + $0x110] sm:$0xff] }
  0x64   : > { %4588 = vmatmul.mubr.msk.f32.gmra.mrb[34].mxu0 %vm507_vm0, %v470_v53  ;;  %v402_v53 = vld [vmem:[%s5563_s17 + $0x118] sm:$0xff] }
  0x65   : > { %4590 = vmatprep.mubr.msk.f32.mxu0 %vm507_vm0, %v471_v54  ;;  %v403_v54 = vld [vmem:[%s5563_s17 + $0x120] sm:$0xff] }
  0x68   : > { %4591 = vmatmul.mubr.msk.f32.gmra.mrb[36].mxu0 %vm507_vm0, %v472_v55  ;;  %v404_v55 = vld [vmem:[%s5563_s17 + $0x128] sm:$0xff] }
  0x69   : > { %4593 = vmatprep.mubr.msk.f32.mxu0 %vm507_vm0, %v473_v56  ;;  %v405_v56 = vld [vmem:[%s5563_s17 + $0x130] sm:$0xff] }
  0x6c   : > { %4594 = vmatmul.mubr.msk.f32.gmra.mrb[38].mxu0 %vm507_vm0, %v474_v57  ;;  %v406_v57 = vld [vmem:[%s5563_s17 + $0x138] sm:$0xff] }
  0x6d   : > { %4596 = vmatprep.mubr.msk.f32.mxu0 %vm507_vm0, %v475_v58  ;;  %v407_v58 = vld [vmem:[%s5563_s17 + $0x140] sm:$0xff] }
  0x70   : > { %4597 = vmatmul.mubr.msk.f32.gmra.mrb[40].mxu0 %vm507_vm0, %v476_v59  ;;  %v408_v59 = vld [vmem:[%s5563_s17 + $0x148] sm:$0xff] }
  0x71   : > { %4599 = vmatprep.mubr.msk.f32.mxu0 %vm507_vm0, %v477_v60  ;;  %v409_v60 = vld [vmem:[%s5563_s17 + $0x150] sm:$0xff] }
  0x74   : > { %4600 = vmatmul.mubr.msk.f32.gmra.mrb[42].mxu0 %vm507_vm0, %v478_v61  ;;  %v410_v61 = vld [vmem:[%s5563_s17 + $0x158] sm:$0xff] }
  0x75   : > { %4602 = vmatprep.mubr.msk.f32.mxu0 %vm507_vm0, %v479_v62  ;;  %v411_v62 = vld [vmem:[%s5563_s17 + $0x160] sm:$0xff] }
  0x78   : > { %4603 = vmatmul.mubr.msk.f32.gmra.mrb[44].mxu0 %vm507_vm0, %v480_v63  ;;  %v412_v63 = vld [vmem:[%s5563_s17 + $0x168] sm:$0xff] }
  0x79   : > { %4605 = vmatprep.mubr.msk.f32.mxu0 %vm507_vm0, %v481_v0  ;;  %v413_v0 = vld [vmem:[%s5563_s17 + $0x170] sm:$0xff] }
  0x7c   : > { %4606 = vmatmul.mubr.msk.f32.gmra.mrb[46].mxu0 %vm507_vm0, %v482_v1  ;;  %v414_v1 = vld [vmem:[%s5563_s17 + $0x178] sm:$0xff] }
  0x7d   : > { %4608 = vmatprep.mubr.msk.f32.mxu0 %vm507_vm0, %v483_v2  ;;  %v415_v2 = vld [vmem:[%s5563_s17 + $0x180] sm:$0xff] }
  0x80   : > { %4609 = vmatmul.mubr.msk.f32.gmra.mrb[48].mxu0 %vm507_vm0, %v484_v3  ;;  %v416_v3 = vld [vmem:[%s5563_s17 + $0x188] sm:$0xff] }
  0x81   : > { %4611 = vmatprep.mubr.msk.f32.mxu0 %vm507_vm0, %v485_v4  ;;  %v417_v4 = vld [vmem:[%s5563_s17 + $0x190] sm:$0xff] }
  0x84   : > { %4612 = vmatmul.mubr.msk.f32.gmra.mrb[50].mxu0 %vm507_vm0, %v486_v5  ;;  %v418_v5 = vld [vmem:[%s5563_s17 + $0x198] sm:$0xff] }
  0x85   : > { %4614 = vmatprep.mubr.msk.f32.mxu0 %vm507_vm0, %v487_v6  ;;  %v2111_v6 = vld [vmem:[%s6787_s5] sm:$0xff] }
  0x88   : > { %4615 = vmatmul.mubr.msk.f32.gmra.mrb[52].mxu0 %vm507_vm0, %v488_v7  ;;  %v2112_v7 = vld [vmem:[%s6787_s5 + $0x8] sm:$0xff] }
  0x89   : > { %4617 = vmatprep.mubr.msk.f32.mxu0 %vm507_vm0, %v489_v8  ;;  %v419_v8 = vld [vmem:[%s5563_s17 + $0x1a0] sm:$0xff] }
  0x8c   : > { %4618 = vmatmul.mubr.msk.f32.gmra.mrb[54].mxu0 %vm507_vm0, %v490_v9  ;;  %v4976_v9 = vpack.c.bf16 %v2112_v7, %v2111_v6 }
  0x8d   : > { %4620 = vmatprep.mubr.msk.f32.mxu0 %vm507_vm0, %v491_v10  ;;  %v420_v10 = vld [vmem:[%s5563_s17 + $0x1a8] sm:$0xff] }
  0x8e   : > { %4977 = vmatprep.subr.bf16.mxu1 %v4976_v9 }
  0x8f   : > { %4979 = vmatpush3.bf16.msra.mxu1 %v4976_v9  ;;  %v2762_v9 = vld [vmem:[%s6788_s6 + $0x10] sm:$0xff] }
  0x90   : > { %4621 = vmatmul.mubr.msk.f32.gmra.mrb[56].mxu0 %vm507_vm0, %v492_v11  ;;  %v2113_v11 = vld [vmem:[%s6787_s5 + $0x10] sm:$0xff] }
  0x91   : > { %4623 = vmatprep.mubr.msk.f32.mxu0 %vm507_vm0, %v493_v12  ;;  %v2114_v12 = vld [vmem:[%s6787_s5 + $0x18] sm:$0xff] }
  0x94   : > { %4624 = vmatmul.mubr.msk.f32.gmra.mrb[58].mxu0 %vm507_vm0, %v494_v13  ;;  %v421_v13 = vld [vmem:[%s5563_s17 + $0x1b0] sm:$0xff] }
  0x95   : > { %4626 = vmatprep.mubr.msk.f32.mxu0 %vm507_vm0, %v495_v14  ;;  %v4980_v14 = vpack.c.bf16 %v2114_v12, %v2113_v11 }
  0x97   : > { %4981 = vmatprep.subr.bf16.mxu1 %v4980_v14 }
  0x98   : > { %4627 = vmatmul.mubr.msk.f32.gmra.mrb[60].mxu0 %vm507_vm0, %v496_v15  ;;  %v422_v15 = vld [vmem:[%s5563_s17 + $0x1b8] sm:$0xff]  ;;  %4983 = vmatpush3.bf16.msra.mxu1 %v4980_v14 }
  0x99   : > { %4629 = vmatprep.mubr.msk.f32.mxu0 %vm507_vm0, %v497_v16  ;;  %v2115_v16 = vld [vmem:[%s6787_s5 + $0x20] sm:$0xff] }
  0x9c   : > { %4630 = vmatmul.mubr.msk.f32.gmra.mrb[62].mxu0 %vm507_vm0, %v498_v17  ;;  %v2116_v17 = vld [vmem:[%s6787_s5 + $0x28] sm:$0xff] }
  0x9d   : > { %4640 = vmatprep.mubr.msk.f32.mxu0 %vm1085_vm1, %v367_v18  ;;  %v423_v18 = vld [vmem:[%s5563_s17 + $0x1c0] sm:$0xff] }
  0xa0   : > { %4641 = vmatmul.mubr.msk.f32.vlgmr.msra.gmra.mrb[0].mxu0 %vm1085_vm1, %v368_v19  ;;  %v4984_v19 = vpack.c.bf16 %v2116_v17, %v2115_v16 }
  0xa1   : > { %4643 = vmatprep.mubr.msk.f32.mxu0 %vm1085_vm1, %v369_v20  ;;  %v424_v20 = vld [vmem:[%s5563_s17 + $0x1c8] sm:$0xff] }
  0xa2   : > { %4985 = vmatprep.subr.bf16.mxu1 %v4984_v19 }
  0xa3   : > { %4987 = vmatpush3.bf16.msra.mxu1 %v4984_v19 }
  0xa4   : > { %4644 = vmatmul.mubr.msk.f32.gmra.mrb[2].mxu0 %vm1085_vm1, %v370_v21  ;;  %v2117_v21 = vld [vmem:[%s6787_s5 + $0x30] sm:$0xff] }
  0xa5   : > { %4646 = vmatprep.mubr.msk.f32.mxu0 %vm1085_vm1, %v371_v22  ;;  %v2118_v22 = vld [vmem:[%s6787_s5 + $0x38] sm:$0xff] }
  0xa8   : > { %4647 = vmatmul.mubr.msk.f32.gmra.mrb[4].mxu0 %vm1085_vm1, %v372_v23  ;;  %v425_v23 = vld [vmem:[%s5563_s17 + $0x1d0] sm:$0xff] }
  0xa9   : > { %4649 = vmatprep.mubr.msk.f32.mxu0 %vm1085_vm1, %v373_v24  ;;  %v4988_v24 = vpack.c.bf16 %v2118_v22, %v2117_v21 }
  0xab   : > { %4989 = vmatprep.subr.bf16.mxu1 %v4988_v24 }
  0xac   : > { %4650 = vmatmul.mubr.msk.f32.gmra.mrb[6].mxu0 %vm1085_vm1, %v374_v25  ;;  %v426_v25 = vld [vmem:[%s5563_s17 + $0x1d8] sm:$0xff]  ;;  %4991 = vmatpush3.bf16.msra.mxu1 %v4988_v24 }
  0xad   : > { %4652 = vmatprep.mubr.msk.f32.mxu0 %vm1085_vm1, %v375_v26  ;;  %v427_v26 = vld [vmem:[%s5563_s17 + $0x1e0] sm:$0xff] }
  0xb0   : > { %4653 = vmatmul.mubr.msk.f32.gmra.mrb[8].mxu0 %vm1085_vm1, %v376_v27  ;;  %v428_v27 = vld [vmem:[%s5563_s17 + $0x1e8] sm:$0xff] }
  0xb1   : > { %4655 = vmatprep.mubr.msk.f32.mxu0 %vm1085_vm1, %v377_v28  ;;  %v429_v28 = vld [vmem:[%s5563_s17 + $0x1f0] sm:$0xff] }
  0xb4   : > { %4656 = vmatmul.mubr.msk.f32.gmra.mrb[10].mxu0 %vm1085_vm1, %v378_v29  ;;  %v430_v29 = vld [vmem:[%s5563_s17 + $0x1f8] sm:$0xff] }
  0xb5   : > { %4658 = vmatprep.mubr.msk.f32.mxu0 %vm1085_vm1, %v379_v30  ;;  %v2760_v30 = vld [vmem:[%s6788_s6] sm:$0xff] }
  0xb8   : > { %4659 = vmatmul.mubr.msk.f32.gmra.mrb[12].mxu0 %vm1085_vm1, %v380_v31  ;;  %v2761_v31 = vld [vmem:[%s6788_s6 + $0x8] sm:$0xff] }
  0xb9   : > { %4661 = vmatprep.mubr.msk.f32.mxu0 %vm1085_vm1, %v381_v32  ;;  %v5727_v32 = vpack.c.bf16 %v2761_v31, %v2760_v30 }
  0xbb   : > { %4993 = vmatprep.subr.bf16.mxu1 %v5727_v32 }
  0xbc   : > { %4662 = vmatmul.mubr.msk.f32.gmra.mrb[14].mxu0 %vm1085_vm1, %v382_v33 }
  0xbd   : > { %4664 = vmatprep.mubr.msk.f32.mxu0 %vm1085_vm1, %v383_v34 }
  0xc0   : > { %4665 = vmatmul.mubr.msk.f32.gmra.mrb[16].mxu0 %vm1085_vm1, %v384_v35 }
  0xc1   : > { %4667 = vmatprep.mubr.msk.f32.mxu0 %vm1085_vm1, %v385_v36 }
  0xc4   : > { %4668 = vmatmul.mubr.msk.f32.gmra.mrb[18].mxu0 %vm1085_vm1, %v386_v37 }
  0xc5   : > { %4670 = vmatprep.mubr.msk.f32.mxu0 %vm1085_vm1, %v387_v38 }
  0xc8   : > { %4671 = vmatmul.mubr.msk.f32.gmra.mrb[20].mxu0 %vm1085_vm1, %v388_v39 }
  0xc9   : > { %4673 = vmatprep.mubr.msk.f32.mxu0 %vm1085_vm1, %v389_v40 }
  0xcc   : > { %4674 = vmatmul.mubr.msk.f32.gmra.mrb[22].mxu0 %vm1085_vm1, %v390_v41 }
  0xcd   : > { %4676 = vmatprep.mubr.msk.f32.mxu0 %vm1085_vm1, %v391_v42 }
  0xd0   : > { %4677 = vmatmul.mubr.msk.f32.gmra.mrb[24].mxu0 %vm1085_vm1, %v392_v43 }
  0xd1   : > { %4679 = vmatprep.mubr.msk.f32.mxu0 %vm1085_vm1, %v393_v44 }
  0xd4   : > { %4680 = vmatmul.mubr.msk.f32.gmra.mrb[26].mxu0 %vm1085_vm1, %v394_v45 }
  0xd5   : > { %4682 = vmatprep.mubr.msk.f32.mxu0 %vm1085_vm1, %v395_v46 }
  0xd8   : > { %4683 = vmatmul.mubr.msk.f32.gmra.mrb[28].mxu0 %vm1085_vm1, %v396_v47 }
  0xd9   : > { %4685 = vmatprep.mubr.msk.f32.mxu0 %vm1085_vm1, %v397_v48 }
  0xdc   : > { %4686 = vmatmul.mubr.msk.f32.gmra.mrb[30].mxu0 %vm1085_vm1, %v398_v49 }
  0xdd   : > { %4688 = vmatprep.mubr.msk.f32.mxu0 %vm1085_vm1, %v399_v50 }
  0xe0   : > { %4689 = vmatmul.mubr.msk.f32.gmra.mrb[32].mxu0 %vm1085_vm1, %v400_v51 }
  0xe1   : > { %4691 = vmatprep.mubr.msk.f32.mxu0 %vm1085_vm1, %v401_v52 }
  0xe4   : > { %4692 = vmatmul.mubr.msk.f32.gmra.mrb[34].mxu0 %vm1085_vm1, %v402_v53 }
  0xe5   : > { %4694 = vmatprep.mubr.msk.f32.mxu0 %vm1085_vm1, %v403_v54 }
  0xe8   : > { %4695 = vmatmul.mubr.msk.f32.gmra.mrb[36].mxu0 %vm1085_vm1, %v404_v55 }
  0xe9   : > { %4697 = vmatprep.mubr.msk.f32.mxu0 %vm1085_vm1, %v405_v56 }
  0xec   : > { %4698 = vmatmul.mubr.msk.f32.gmra.mrb[38].mxu0 %vm1085_vm1, %v406_v57 }
  0xed   : > { %4700 = vmatprep.mubr.msk.f32.mxu0 %vm1085_vm1, %v407_v58 }
  0xf0   : > { %4701 = vmatmul.mubr.msk.f32.gmra.mrb[40].mxu0 %vm1085_vm1, %v408_v59 }
  0xf1   : > { %4703 = vmatprep.mubr.msk.f32.mxu0 %vm1085_vm1, %v409_v60 }
  0xf4   : > { %4704 = vmatmul.mubr.msk.f32.gmra.mrb[42].mxu0 %vm1085_vm1, %v410_v61 }
  0xf5   : > { %4706 = vmatprep.mubr.msk.f32.mxu0 %vm1085_vm1, %v411_v62 }
  0xf8   : > { %4707 = vmatmul.mubr.msk.f32.gmra.mrb[44].mxu0 %vm1085_vm1, %v412_v63 }
  0xf9   : > { %4709 = vmatprep.mubr.msk.f32.mxu0 %vm1085_vm1, %v413_v0 }
  0xfc   : > { %4710 = vmatmul.mubr.msk.f32.gmra.mrb[46].mxu0 %vm1085_vm1, %v414_v1 }
  0xfd   : > { %4712 = vmatprep.mubr.msk.f32.mxu0 %vm1085_vm1, %v415_v2 }
 0x100   : > { %4713 = vmatmul.mubr.msk.f32.gmra.mrb[48].mxu0 %vm1085_vm1, %v416_v3 }
 0x101   : > { %4715 = vmatprep.mubr.msk.f32.mxu0 %vm1085_vm1, %v417_v4 }
 0x104   : > { %4716 = vmatmul.mubr.msk.f32.gmra.mrb[50].mxu0 %vm1085_vm1, %v418_v5 }
 0x105   : > { %4718 = vmatprep.mubr.msk.f32.mxu0 %vm1085_vm1, %v419_v8 }
 0x108   : > { %4719 = vmatmul.mubr.msk.f32.gmra.mrb[52].mxu0 %vm1085_vm1, %v420_v10  ;;  %v2763_v10 = vld [vmem:[%s6788_s6 + $0x18] sm:$0xff] }
 0x109   : > { %4721 = vmatprep.mubr.msk.f32.mxu0 %vm1085_vm1, %v421_v13 }
 0x10c   : > { %4722 = vmatmul.mubr.msk.f32.gmra.mrb[54].mxu0 %vm1085_vm1, %v422_v15 }
 0x10d   : > { %4724 = vmatprep.mubr.msk.f32.mxu0 %vm1085_vm1, %v423_v18  ;;  %v4996_v18 = vpack.c.bf16 %v2763_v10, %v2762_v9 }
 0x110   : > { %4725 = vmatmul.mubr.msk.f32.gmra.mrb[56].mxu0 %vm1085_vm1, %v424_v20 }
 0x111   : > { %4727 = vmatprep.mubr.msk.f32.mxu0 %vm1085_vm1, %v425_v23 }
 0x114   : > { %4728 = vmatmul.mubr.msk.f32.gmra.mrb[58].mxu0 %vm1085_vm1, %v426_v25 }
 0x115   : > { %4730 = vmatprep.mubr.msk.f32.mxu0 %vm1085_vm1, %v427_v26 }
 0x118   : > { %4731 = vmatmul.mubr.msk.f32.gmra.mrb[60].mxu0 %vm1085_vm1, %v428_v27 }
 0x119   : > { %4733 = vmatprep.mubr.msk.f32.mxu0 %vm1085_vm1, %v429_v28 }
 0x11c   : > { %4734 = vmatmul.mubr.msk.f32.gmra.mrb[62].mxu0 %vm1085_vm1, %v430_v29 }
 0x173   : > { %v5730_v33 = vpop.f32.mrb[0].mxu0 }
 0x174   : > { %v4047_v34 = vmul.f32 -1.442695, %v5730_v33  ;;  %v5733_v35 = vpop.f32.mrb[1].mxu0 }
 0x175   : > { %v4046_v36 = vmul.f32 -1.442695, %v5733_v35 }
 0x176   : > { %5073 = vpow2.f32 %v4047_v34 }
 0x177   : > { %5075 = vpow2.f32 %v4046_v36  ;;  %v5736_v37 = vpop.f32.mrb[2].mxu0 }
 0x178   : > { %v4049_v38 = vmul.f32 -1.442695, %v5736_v37  ;;  %v5739_v39 = vpop.f32.mrb[3].mxu0 }
 0x179   : > { %v4048_v40 = vmul.f32 -1.442695, %v5739_v39 }
 0x17a   : > { %5077 = vpow2.f32 %v4049_v38 }
 0x17b   : > { %5079 = vpow2.f32 %v4048_v40  ;;  %v5742_v41 = vpop.f32.mrb[4].mxu0 }
 0x17c   : > { %v4051_v42 = vmul.f32 -1.442695, %v5742_v41  ;;  %v5745_v43 = vpop.f32.mrb[5].mxu0 }
 0x17d   : > { %v4050_v44 = vmul.f32 -1.442695, %v5745_v43 }
 0x17e   : > { %5081 = vpow2.f32 %v4051_v42 }
 0x17f   : > { %5083 = vpow2.f32 %v4050_v44  ;;  %v5748_v45 = vpop.f32.mrb[6].mxu0 }
 0x180   : > { %v5074_v46 = vpop.eup %5073  ;;  %v4053_v47 = vmul.f32 -1.442695, %v5748_v45  ;;  %v5751_v48 = vpop.f32.mrb[7].mxu0 }
 0x181   : > { %v5076_v49 = vpop.eup %5075  ;;  %v1856_v50 = vadd.f32 1.0, %v5074_v46  ;;  %v4052_v51 = vmul.f32 -1.442695, %v5751_v48 }
 0x182   : > { %v1855_v52 = vadd.f32 1.0, %v5076_v49  ;;  %5085 = vpow2.f32 %v4053_v47 }
 0x183   : > { %5087 = vrcp.f32 %v1856_v50  ;;  %v5754_v53 = vpop.f32.mrb[8].mxu0 }
 0x184   : > { %v5078_v54 = vpop.eup %5077  ;;  %5089 = vrcp.f32 %v1855_v52  ;;  %v4055_v55 = vmul.f32 -1.442695, %v5754_v53  ;;  %v5757_v56 = vpop.f32.mrb[9].mxu0 }
 0x185   : > { %v5080_v57 = vpop.eup %5079  ;;  %v1858_v58 = vadd.f32 1.0, %v5078_v54  ;;  %5091 = vpow2.f32 %v4052_v51  ;;  %v4054_v59 = vmul.f32 -1.442695, %v5757_v56 }
 0x186   : > { %v1857_v60 = vadd.f32 1.0, %v5080_v57  ;;  %5093 = vpow2.f32 %v4055_v55 }
 0x187   : > { %5095 = vrcp.f32 %v1858_v58  ;;  %v5760_v61 = vpop.f32.mrb[10].mxu0 }
 0x188   : > { %v5082_v62 = vpop.eup %5081  ;;  %5097 = vrcp.f32 %v1857_v60  ;;  %v4057_v63 = vmul.f32 -1.442695, %v5760_v61  ;;  %v5763_v0 = vpop.f32.mrb[11].mxu0 }
 0x189   : > { %v5084_v1 = vpop.eup %5083  ;;  %v1860_v2 = vadd.f32 1.0, %v5082_v62  ;;  %5099 = vpow2.f32 %v4054_v59  ;;  %v4056_v3 = vmul.f32 -1.442695, %v5763_v0 }
 0x18a   : > { %v1859_v4 = vadd.f32 1.0, %v5084_v1  ;;  %5101 = vpow2.f32 %v4057_v63 }
 0x18b   : > { %5103 = vrcp.f32 %v1860_v2  ;;  %v5766_v5 = vpop.f32.mrb[12].mxu0 }
 0x18c   : > { %v5086_v6 = vpop.eup %5085  ;;  %5105 = vrcp.f32 %v1859_v4  ;;  %v4059_v7 = vmul.f32 -1.442695, %v5766_v5  ;;  %v5769_v8 = vpop.f32.mrb[13].mxu0 }
 0x18d   : > { %v5088_v11 = vpop.eup %5087  ;;  %v1862_v12 = vadd.f32 1.0, %v5086_v6  ;;  %5107 = vpow2.f32 %v4056_v3  ;;  %v4058_v13 = vmul.f32 -1.442695, %v5769_v8 }
 0x18e   : > { %v5090_v14 = vpop.eup %5089  ;;  %5109 = vpow2.f32 %v4059_v7  ;;  %v2048_v20 = vmul.f32 %v5088_v11, %v5730_v33 }
 0x18f   : > { %v5092_v15 = vpop.eup %5091  ;;  %v5778_v16 = vpop.f32.mrb[14].mxu0  ;;  %v2047_v17 = vmul.f32 %v5090_v14, %v5733_v35  ;;  %5111 = vpow2.f32 %v4058_v13 }
 0x190   : > { %v5094_v19 = vpop.eup %5093  ;;  %v1861_v21 = vadd.f32 1.0, %v5092_v15  ;;  %v4061_v22 = vmul.f32 -1.442695, %v5778_v16  ;;  %v5783_v23 = vpop.f32.mrb[15].mxu0  ;;  %5113 = vrcp.f32 %v1862_v12 }
 0x191   : > { %v5096_v24 = vpop.eup %5095  ;;  %v1864_v25 = vadd.f32 1.0, %v5094_v19  ;;  %v4060_v26 = vmul.f32 -1.442695, %v5783_v23  ;;  %4752 = vmatprep.mubr.msk.f32.mxu1 %vm507_vm0, %v2047_v17 }
 0x192   : > { %v5098_v27 = vpop.eup %5097  ;;  %5115 = vrcp.f32 %v1861_v21  ;;  %4753 = vmatmul.mubr.msk.f32.vlgmr.msra.gmra.mrb[0].mxu1 %vm507_vm0, %v2048_v20  ;;  %v2050_v33 = vmul.f32 %v5096_v24, %v5736_v37 }
 0x193   : > { %v5100_v28 = vpop.eup %5099  ;;  %v2049_v29 = vmul.f32 %v5098_v27, %v5739_v39  ;;  %5117 = vrcp.f32 %v1864_v25  ;;  %v5789_v30 = vpop.f32.mrb[16].mxu0  ;;  %4995 = vmatpush3.bf16.msra.mxu1 %v5727_v32 }
 0x194   : > { %v5102_v31 = vpop.eup %5101  ;;  %v1863_v34 = vadd.f32 1.0, %v5100_v28  ;;  %5119 = vpow2.f32 %v4061_v22  ;;  %v4063_v35 = vmul.f32 -1.442695, %v5789_v30  ;;  %v5794_v36 = vpop.f32.mrb[17].mxu0  ;;  %4997 = vmatprep.subr.bf16.mxu1 %v4996_v18 }
 0x195   : > { %v5104_v38 = vpop.eup %5103  ;;  %v1866_v40 = vadd.f32 1.0, %v5102_v31  ;;  %5121 = vpow2.f32 %v4060_v26  ;;  %v4062_v39 = vmul.f32 -1.442695, %v5794_v36  ;;  %4755 = vmatprep.mubr.msk.f32.mxu1 %vm507_vm0, %v2049_v29 }
 0x196   : > { %v5106_v42 = vpop.eup %5105  ;;  %5123 = vrcp.f32 %v1863_v34  ;;  %4756 = vmatmul.mubr.msk.f32.gmra.mrb[2].mxu1 %vm507_vm0, %v2050_v33  ;;  %v2052_v47 = vmul.f32 %v5104_v38, %v5742_v41 }
 0x197   : > { %v5108_v32 = vpop.eup %5107  ;;  %v2051_v37 = vmul.f32 %v5106_v42, %v5745_v43  ;;  %5125 = vrcp.f32 %v1866_v40  ;;  %v5800_v44 = vpop.f32.mrb[18].mxu0  ;;  %4999 = vmatpush3.bf16.msra.mxu1 %v4996_v18 }
 0x198   : > { %v5110_v46 = vpop.eup %5109  ;;  %v1865_v49 = vadd.f32 1.0, %v5108_v32  ;;  %5127 = vpow2.f32 %v4063_v35  ;;  %v4065_v50 = vmul.f32 -1.442695, %v5800_v44  ;;  %v5804_v51 = vpop.f32.mrb[19].mxu0 }
 0x199   : > { %v1868_v52 = vadd.f32 1.0, %v5110_v46  ;;  %5129 = vpow2.f32 %v4062_v39  ;;  %4758 = vmatprep.mubr.msk.f32.mxu1 %vm507_vm0, %v2051_v37  ;;  %v5112_v54 = vpop.eup %5111  ;;  %v4064_v43 = vmul.f32 -1.442695, %v5804_v51 }
 0x19a   : > { %5131 = vrcp.f32 %v1865_v49  ;;  %4759 = vmatmul.mubr.msk.f32.gmra.mrb[4].mxu1 %vm507_vm0, %v2052_v47  ;;  %v5114_v55 = vpop.eup %5113  ;;  %v1867_v57 = vadd.f32 1.0, %v5112_v54 }
 0x19b   : > { %5133 = vrcp.f32 %v1868_v52  ;;  %v5809_v41 = vpop.f32.mrb[20].mxu0  ;;  %v2054_v3 = vmul.f32 %v5114_v55, %v5748_v45 }
 0x19c   : > { %v5116_v58 = vpop.eup %5115  ;;  %5135 = vpow2.f32 %v4065_v50  ;;  %v4067_v59 = vmul.f32 -1.442695, %v5809_v41  ;;  %v5812_v60 = vpop.f32.mrb[21].mxu0 }
 0x19d   : > { %v5118_v62 = vpop.eup %5117  ;;  %v2053_v63 = vmul.f32 %v5116_v58, %v5751_v48  ;;  %5137 = vrcp.f32 %v1867_v57  ;;  %v4066_v1 = vmul.f32 -1.442695, %v5812_v60 }
 0x19e   : > { %v5120_v2 = vpop.eup %5119  ;;  %5139 = vpow2.f32 %v4064_v43  ;;  %v2056_v15 = vmul.f32 %v5118_v62, %v5754_v53 }
 0x19f   : > { %v5122_v4 = vpop.eup %5121  ;;  %v1870_v6 = vadd.f32 1.0, %v5120_v2  ;;  %5141 = vpow2.f32 %v4067_v59  ;;  %4761 = vmatprep.mubr.msk.f32.mxu1 %vm507_vm0, %v2053_v63  ;;  %v5818_v7 = vpop.f32.mrb[22].mxu0 }
 0x1a0   : > { %v5124_v9 = vpop.eup %5123  ;;  %v1869_v10 = vadd.f32 1.0, %v5122_v4  ;;  %5143 = vpow2.f32 %v4066_v1  ;;  %4762 = vmatmul.mubr.msk.f32.gmra.mrb[6].mxu1 %vm507_vm0, %v2054_v3  ;;  %v4069_v48 = vmul.f32 -1.442695, %v5818_v7  ;;  %v5822_v11 = vpop.f32.mrb[23].mxu0 }
 0x1a1   : > { %v5126_v12 = vpop.eup %5125  ;;  %v2055_v45 = vmul.f32 %v5124_v9, %v5757_v56  ;;  %5145 = vrcp.f32 %v1870_v6  ;;  %v4068_v13 = vmul.f32 -1.442695, %v5822_v11 }
 0x1a2   : > { %v5128_v14 = vpop.eup %5127  ;;  %5147 = vrcp.f32 %v1869_v10  ;;  %v2058_v27 = vmul.f32 %v5126_v12, %v5760_v61 }
 0x1a3   : > { %v5130_v17 = vpop.eup %5129  ;;  %v1872_v18 = vadd.f32 1.0, %v5128_v14  ;;  %5149 = vpow2.f32 %v4069_v48  ;;  %4764 = vmatprep.mubr.msk.f32.mxu1 %vm507_vm0, %v2055_v45  ;;  %v5828_v19 = vpop.f32.mrb[24].mxu0 }
 0x1a4   : > { %v5132_v20 = vpop.eup %5131  ;;  %v1871_v21 = vadd.f32 1.0, %v5130_v17  ;;  %5151 = vpow2.f32 %v4068_v13  ;;  %4765 = vmatmul.mubr.msk.f32.gmra.mrb[8].mxu1 %vm507_vm0, %v2056_v15  ;;  %v4071_v56 = vmul.f32 -1.442695, %v5828_v19  ;;  %v5832_v22 = vpop.f32.mrb[25].mxu0 }
 0x1a5   : > { %v5134_v24 = vpop.eup %5133  ;;  %v2057_v53 = vmul.f32 %v5132_v20, %v5763_v0  ;;  %5153 = vrcp.f32 %v1872_v18  ;;  %v4070_v25 = vmul.f32 -1.442695, %v5832_v22 }
 0x1a6   : > { %v5136_v26 = vpop.eup %5135  ;;  %5155 = vrcp.f32 %v1871_v21  ;;  %v2060_v39 = vmul.f32 %v5134_v24, %v5766_v5 }
 0x1a7   : > { %v5138_v28 = vpop.eup %5137  ;;  %v1874_v29 = vadd.f32 1.0, %v5136_v26  ;;  %5157 = vpow2.f32 %v4071_v56  ;;  %4767 = vmatprep.mubr.msk.f32.mxu1 %vm507_vm0, %v2057_v53  ;;  %v5838_v31 = vpop.f32.mrb[26].mxu0 }
 0x1a8   : > { %v5140_v33 = vpop.eup %5139  ;;  %v2059_v34 = vmul.f32 %v5138_v28, %v5769_v8  ;;  %5159 = vpow2.f32 %v4070_v25  ;;  %4768 = vmatmul.mubr.msk.f32.gmra.mrb[10].mxu1 %vm507_vm0, %v2058_v27  ;;  %v4073_v0 = vmul.f32 -1.442695, %v5838_v31  ;;  %v5843_v35 = vpop.f32.mrb[27].mxu0 }
 0x1a9   : > { %v5142_v38 = vpop.eup %5141  ;;  %5161 = vrcp.f32 %v1874_v29  ;;  %v1873_v61 = vadd.f32 1.0, %v5140_v33  ;;  %v4072_v32 = vmul.f32 -1.442695, %v5843_v35 }
 0x1aa   : > { %v5144_v40 = vpop.eup %5143  ;;  %v1876_v42 = vadd.f32 1.0, %v5142_v38  ;;  %5163 = vpow2.f32 %v4073_v0  ;;  %4770 = vmatprep.mubr.msk.f32.mxu1 %vm507_vm0, %v2059_v34 }
 0x1ab   : > { %v5146_v8 = vpop.eup %5145  ;;  %5165 = vrcp.f32 %v1873_v61  ;;  %v1875_v37 = vadd.f32 1.0, %v5144_v40  ;;  %v5848_v46 = vpop.f32.mrb[28].mxu0 }
 0x1ac   : > { %v5148_v47 = vpop.eup %5147  ;;  %5167 = vrcp.f32 %v1876_v42  ;;  %4771 = vmatmul.mubr.msk.f32.gmra.mrb[12].mxu1 %vm507_vm0, %v2060_v39  ;;  %v4075_v49 = vmul.f32 -1.442695, %v5848_v46  ;;  %v5852_v50 = vpop.f32.mrb[29].mxu0  ;;  %v2062_v43 = vmul.f32 %v5146_v8, %v5778_v16 }
 0x1ad   : > { %v5150_v5 = vpop.eup %5149  ;;  %v2061_v52 = vmul.f32 %v5148_v47, %v5783_v23  ;;  %5169 = vrcp.f32 %v1875_v37  ;;  %v4074_v57 = vmul.f32 -1.442695, %v5852_v50 }
 0x1ae   : > { %v5152_v54 = vpop.eup %5151  ;;  %v1878_v55 = vadd.f32 1.0, %v5150_v5  ;;  %5171 = vpow2.f32 %v4072_v32 }
 0x1af   : > { %v5154_v58 = vpop.eup %5153  ;;  %v1877_v59 = vadd.f32 1.0, %v5152_v54  ;;  %5173 = vpow2.f32 %v4075_v49  ;;  %4773 = vmatprep.mubr.msk.f32.mxu1 %vm507_vm0, %v2061_v52  ;;  %v5858_v62 = vpop.f32.mrb[30].mxu0 }
 0x1b0   : > { %v5156_v63 = vpop.eup %5155  ;;  %5175 = vrcp.f32 %v1878_v55  ;;  %4774 = vmatmul.mubr.msk.f32.gmra.mrb[14].mxu1 %vm507_vm0, %v2062_v43  ;;  %v4077_v23 = vmul.f32 -1.442695, %v5858_v62  ;;  %v5862_v1 = vpop.f32.mrb[31].mxu0  ;;  %v2064_v4 = vmul.f32 %v5154_v58, %v5789_v30 }
 0x1b1   : > { %v5158_v16 = vpop.eup %5157  ;;  %v2063_v2 = vmul.f32 %v5156_v63, %v5794_v36  ;;  %5177 = vrcp.f32 %v1877_v59  ;;  %v4076_v9 = vmul.f32 -1.442695, %v5862_v1 }
 0x1b2   : > { %v5160_v3 = vpop.eup %5159  ;;  %v1880_v6 = vadd.f32 1.0, %v5158_v16  ;;  %5179 = vpow2.f32 %v4074_v57 }
 0x1b3   : > { %v5162_v10 = vpop.eup %5161  ;;  %v1879_v48 = vadd.f32 1.0, %v5160_v3  ;;  %5181 = vpow2.f32 %v4077_v23  ;;  %4776 = vmatprep.mubr.msk.f32.mxu1 %vm507_vm0, %v2063_v2  ;;  %v5868_v12 = vpop.f32.mrb[32].mxu0 }
 0x1b4   : > { %v5164_v45 = vpop.eup %5163  ;;  %5183 = vrcp.f32 %v1880_v6  ;;  %4777 = vmatmul.mubr.msk.f32.gmra.mrb[16].mxu1 %vm507_vm0, %v2064_v4  ;;  %v4079_v36 = vmul.f32 -1.442695, %v5868_v12  ;;  %v5872_v13 = vpop.f32.mrb[33].mxu0  ;;  %v2066_v21 = vmul.f32 %v5162_v10, %v5800_v44 }
 0x1b5   : > { %v5166_v30 = vpop.eup %5165  ;;  %5185 = vrcp.f32 %v1879_v48  ;;  %v1882_v14 = vadd.f32 1.0, %v5164_v45  ;;  %v4078_v15 = vmul.f32 -1.442695, %v5872_v13 }
 0x1b6   : > { %v5168_v17 = vpop.eup %5167  ;;  %v2065_v18 = vmul.f32 %v5166_v30, %v5804_v51  ;;  %5187 = vpow2.f32 %v4076_v9 }
 0x1b7   : > { %v5170_v20 = vpop.eup %5169  ;;  %5189 = vrcp.f32 %v1882_v14  ;;  %v5877_v56 = vpop.f32.mrb[34].mxu0  ;;  %v2068_v33 = vmul.f32 %v5168_v17, %v5809_v41 }
 0x1b8   : > { %v5172_v24 = vpop.eup %5171  ;;  %v2067_v53 = vmul.f32 %v5170_v20, %v5812_v60  ;;  %5191 = vpow2.f32 %v4079_v36  ;;  %4779 = vmatprep.mubr.msk.f32.mxu1 %vm507_vm0, %v2065_v18  ;;  %v4081_v25 = vmul.f32 -1.442695, %v5877_v56  ;;  %v5882_v26 = vpop.f32.mrb[35].mxu0 }
 0x1b9   : > { %v5174_v27 = vpop.eup %5173  ;;  %v1881_v28 = vadd.f32 1.0, %v5172_v24  ;;  %5193 = vpow2.f32 %v4078_v15  ;;  %4780 = vmatmul.mubr.msk.f32.gmra.mrb[18].mxu1 %vm507_vm0, %v2066_v21  ;;  %v4080_v44 = vmul.f32 -1.442695, %v5882_v26 }
 0x1ba   : > { %v5176_v51 = vpop.eup %5175  ;;  %v1884_v29 = vadd.f32 1.0, %v5174_v27  ;;  %5195 = vpow2.f32 %v4081_v25  ;;  %4782 = vmatprep.mubr.msk.f32.mxu1 %vm507_vm0, %v2067_v53 }
 0x1bb   : > { %v5178_v60 = vpop.eup %5177  ;;  %5197 = vrcp.f32 %v1881_v28  ;;  %v5888_v34 = vpop.f32.mrb[36].mxu0 }
 0x1bc   : > { %v5180_v0 = vpop.eup %5179  ;;  %v2069_v38 = vmul.f32 %v5178_v60, %v5822_v11  ;;  %5199 = vrcp.f32 %v1884_v29  ;;  %v4083_v61 = vmul.f32 -1.442695, %v5888_v34  ;;  %v5892_v40 = vpop.f32.mrb[37].mxu0  ;;  %v2070_v11 = vmul.f32 %v5176_v51, %v5818_v7 }
 0x1bd   : > { %v5182_v39 = vpop.eup %5181  ;;  %v1883_v42 = vadd.f32 1.0, %v5180_v0  ;;  %5201 = vpow2.f32 %v4080_v44  ;;  %4783 = vmatmul.mubr.msk.f32.gmra.mrb[20].mxu1 %vm507_vm0, %v2068_v33  ;;  %v4082_v32 = vmul.f32 -1.442695, %v5892_v40 }
 0x1be   : > { %v5184_v8 = vpop.eup %5183  ;;  %v1886_v41 = vadd.f32 1.0, %v5182_v39  ;;  %5203 = vpow2.f32 %v4083_v61  ;;  %4785 = vmatprep.mubr.msk.f32.mxu1 %vm507_vm0, %v2069_v38 }
 0x1bf   : > { %v5186_v37 = vpop.eup %5185  ;;  %5205 = vrcp.f32 %v1883_v42  ;;  %v5898_v47 = vpop.f32.mrb[38].mxu0  ;;  %v2072_v59 = vmul.f32 %v5184_v8, %v5828_v19 }
 0x1c0   : > { %v5188_v49 = vpop.eup %5187  ;;  %v2071_v5 = vmul.f32 %v5186_v37, %v5832_v22  ;;  %5207 = vrcp.f32 %v1886_v41  ;;  %v4085_v52 = vmul.f32 -1.442695, %v5898_v47  ;;  %v5902_v54 = vpop.f32.mrb[39].mxu0 }
 0x1c1   : > { %v5190_v43 = vpop.eup %5189  ;;  %v1885_v55 = vadd.f32 1.0, %v5188_v49  ;;  %5209 = vpow2.f32 %v4082_v32  ;;  %4786 = vmatmul.mubr.msk.f32.gmra.mrb[22].mxu1 %vm507_vm0, %v2070_v11  ;;  %v4084_v57 = vmul.f32 -1.442695, %v5902_v54 }
 0x1c2   : > { %v5192_v58 = vpop.eup %5191  ;;  %5211 = vpow2.f32 %v4085_v52  ;;  %4788 = vmatprep.mubr.msk.f32.mxu1 %vm507_vm0, %v2071_v5  ;;  %v2074_v45 = vmul.f32 %v5190_v43, %v5838_v31 }
 0x1c3   : > { %v5194_v7 = vpop.eup %5193  ;;  %5213 = vrcp.f32 %v1885_v55  ;;  %v1888_v22 = vadd.f32 1.0, %v5192_v58  ;;  %v5908_v63 = vpop.f32.mrb[40].mxu0 }
 0x1c4   : > { %v5196_v23 = vpop.eup %5195  ;;  %v1887_v16 = vadd.f32 1.0, %v5194_v7  ;;  %5215 = vpow2.f32 %v4084_v57  ;;  %v4087_v2 = vmul.f32 -1.442695, %v5908_v63  ;;  %v5911_v3 = vpop.f32.mrb[41].mxu0 }
 0x1c5   : > { %v5198_v4 = vpop.eup %5197  ;;  %5217 = vrcp.f32 %v1888_v22  ;;  %v1890_v6 = vadd.f32 1.0, %v5196_v23  ;;  %4789 = vmatmul.mubr.msk.f32.gmra.mrb[24].mxu1 %vm507_vm0, %v2072_v59  ;;  %v4086_v9 = vmul.f32 -1.442695, %v5911_v3 }
 0x1c6   : > { %v5200_v10 = vpop.eup %5199  ;;  %v2073_v19 = vmul.f32 %v5198_v4, %v5843_v35  ;;  %5219 = vrcp.f32 %v1887_v16 }
 0x1c7   : > { %v5202_v48 = vpop.eup %5201  ;;  %5221 = vrcp.f32 %v1890_v6  ;;  %v5917_v36 = vpop.f32.mrb[42].mxu0  ;;  %v2076_v53 = vmul.f32 %v5200_v10, %v5848_v46 }
 0x1c8   : > { %v5204_v30 = vpop.eup %5203  ;;  %v1889_v14 = vadd.f32 1.0, %v5202_v48  ;;  %5223 = vpow2.f32 %v4087_v2  ;;  %4791 = vmatprep.mubr.msk.f32.mxu1 %vm507_vm0, %v2073_v19  ;;  %v4089_v15 = vmul.f32 -1.442695, %v5917_v36  ;;  %v5921_v17 = vpop.f32.mrb[43].mxu0 }
 0x1c9   : > { %v5206_v18 = vpop.eup %5205  ;;  %v1892_v20 = vadd.f32 1.0, %v5204_v30  ;;  %5225 = vpow2.f32 %v4086_v9  ;;  %4792 = vmatmul.mubr.msk.f32.gmra.mrb[26].mxu1 %vm507_vm0, %v2074_v45  ;;  %v4088_v35 = vmul.f32 -1.442695, %v5921_v17 }
 0x1ca   : > { %v5208_v31 = vpop.eup %5207  ;;  %v2075_v21 = vmul.f32 %v5206_v18, %v5852_v50  ;;  %5227 = vrcp.f32 %v1889_v14 }
 0x1cb   : > { %v5210_v24 = vpop.eup %5209  ;;  %5229 = vrcp.f32 %v1892_v20  ;;  %v5927_v25 = vpop.f32.mrb[44].mxu0  ;;  %v2078_v38 = vmul.f32 %v5208_v31, %v5858_v62 }
 0x1cc   : > { %v5212_v27 = vpop.eup %5211  ;;  %v1891_v28 = vadd.f32 1.0, %v5210_v24  ;;  %5231 = vpow2.f32 %v4089_v15  ;;  %4794 = vmatprep.mubr.msk.f32.mxu1 %vm507_vm0, %v2075_v21  ;;  %v4091_v44 = vmul.f32 -1.442695, %v5927_v25  ;;  %v5931_v51 = vpop.f32.mrb[45].mxu0 }
 0x1cd   : > { %v5214_v29 = vpop.eup %5213  ;;  %v1894_v60 = vadd.f32 1.0, %v5212_v27  ;;  %5233 = vpow2.f32 %v4088_v35  ;;  %4795 = vmatmul.mubr.msk.f32.gmra.mrb[28].mxu1 %vm507_vm0, %v2076_v53  ;;  %v4090_v33 = vmul.f32 -1.442695, %v5931_v51 }
 0x1ce   : > { %v5216_v50 = vpop.eup %5215  ;;  %v2077_v46 = vmul.f32 %v5214_v29, %v5862_v1  ;;  %5235 = vrcp.f32 %v1891_v28 }
 0x1cf   : > { %v5218_v0 = vpop.eup %5217  ;;  %5237 = vrcp.f32 %v1894_v60  ;;  %v1893_v61 = vadd.f32 1.0, %v5216_v50  ;;  %v5937_v39 = vpop.f32.mrb[46].mxu0 }
 0x1d0   : > { %v5220_v42 = vpop.eup %5219  ;;  %5239 = vpow2.f32 %v4091_v44  ;;  %4797 = vmatprep.mubr.msk.f32.mxu1 %vm507_vm0, %v2077_v46  ;;  %v4093_v32 = vmul.f32 -1.442695, %v5937_v39  ;;  %v5941_v8 = vpop.f32.mrb[47].mxu0  ;;  %v2080_v49 = vmul.f32 %v5218_v0, %v5868_v12 }
 0x1d1   : > { %v5222_v41 = vpop.eup %5221  ;;  %v2079_v1 = vmul.f32 %v5220_v42, %v5872_v13  ;;  %5241 = vrcp.f32 %v1893_v61  ;;  %4798 = vmatmul.mubr.msk.f32.gmra.mrb[30].mxu1 %vm507_vm0, %v2078_v38  ;;  %v4092_v62 = vmul.f32 -1.442695, %v5941_v8 }
 0x1d2   : > { %v5224_v37 = vpop.eup %5223  ;;  %5243 = vpow2.f32 %v4090_v33  ;;  %v2082_v23 = vmul.f32 %v5222_v41, %v5877_v56 }
 0x1d3   : > { %v5226_v11 = vpop.eup %5225  ;;  %v1896_v5 = vadd.f32 1.0, %v5224_v37  ;;  %5245 = vpow2.f32 %v4093_v32  ;;  %4800 = vmatprep.mubr.msk.f32.mxu1 %vm507_vm0, %v2079_v1  ;;  %v5948_v52 = vpop.f32.mrb[48].mxu0 }
 0x1d4   : > { %v5228_v43 = vpop.eup %5227  ;;  %v1895_v55 = vadd.f32 1.0, %v5226_v11  ;;  %5247 = vpow2.f32 %v4092_v62  ;;  %v4095_v13 = vmul.f32 -1.442695, %v5948_v52  ;;  %v5951_v57 = vpop.f32.mrb[49].mxu0 }
 0x1d5   : > { %v5230_v58 = vpop.eup %5229  ;;  %v2081_v7 = vmul.f32 %v5228_v43, %v5882_v26  ;;  %5249 = vrcp.f32 %v1896_v5  ;;  %4801 = vmatmul.mubr.msk.f32.gmra.mrb[32].mxu1 %vm507_vm0, %v2080_v49  ;;  %v4094_v12 = vmul.f32 -1.442695, %v5951_v57 }
 0x1d6   : > { %v5232_v59 = vpop.eup %5231  ;;  %5251 = vrcp.f32 %v1895_v55  ;;  %v2084_v30 = vmul.f32 %v5230_v58, %v5888_v34 }
 0x1d7   : > { %v5234_v22 = vpop.eup %5233  ;;  %v1898_v16 = vadd.f32 1.0, %v5232_v59  ;;  %5253 = vpow2.f32 %v4095_v13  ;;  %4803 = vmatprep.mubr.msk.f32.mxu1 %vm507_vm0, %v2081_v7  ;;  %v5958_v2 = vpop.f32.mrb[50].mxu0 }
 0x1d8   : > { %v5236_v4 = vpop.eup %5235  ;;  %v1897_v6 = vadd.f32 1.0, %v5234_v22  ;;  %5255 = vpow2.f32 %v4094_v12  ;;  %v4097_v26 = vmul.f32 -1.442695, %v5958_v2  ;;  %v5961_v9 = vpop.f32.mrb[51].mxu0 }
 0x1d9   : > { %v5238_v10 = vpop.eup %5237  ;;  %v2083_v19 = vmul.f32 %v5236_v4, %v5892_v40  ;;  %5257 = vrcp.f32 %v1898_v16  ;;  %4804 = vmatmul.mubr.msk.f32.gmra.mrb[34].mxu1 %vm507_vm0, %v2082_v23  ;;  %v4096_v56 = vmul.f32 -1.442695, %v5961_v9 }
 0x1da   : > { %v5240_v48 = vpop.eup %5239  ;;  %5259 = vrcp.f32 %v1897_v6 }
 0x1db   : > { %v5242_v45 = vpop.eup %5241  ;;  %v1900_v14 = vadd.f32 1.0, %v5240_v48  ;;  %5261 = vpow2.f32 %v4097_v26  ;;  %4806 = vmatprep.mubr.msk.f32.mxu1 %vm507_vm0, %v2083_v19  ;;  %v5968_v15 = vpop.f32.mrb[52].mxu0 }
 0x1dc   : > { %v5244_v18 = vpop.eup %5243  ;;  %v2085_v20 = vmul.f32 %v5242_v45, %v5902_v54  ;;  %5263 = vpow2.f32 %v4096_v56  ;;  %v4099_v40 = vmul.f32 -1.442695, %v5968_v15  ;;  %v5972_v35 = vpop.f32.mrb[53].mxu0  ;;  %v2086_v54 = vmul.f32 %v5238_v10, %v5898_v47 }
 0x1dd   : > { %v5246_v31 = vpop.eup %5245  ;;  %5265 = vrcp.f32 %v1900_v14  ;;  %v1899_v21 = vadd.f32 1.0, %v5244_v18  ;;  %4807 = vmatmul.mubr.msk.f32.gmra.mrb[36].mxu1 %vm507_vm0, %v2084_v30  ;;  %v4098_v53 = vmul.f32 -1.442695, %v5972_v35 }
 0x1de   : > { %v5248_v34 = vpop.eup %5247  ;;  %v1902_v24 = vadd.f32 1.0, %v5246_v31  ;;  %5267 = vpow2.f32 %v4099_v40  ;;  %4809 = vmatprep.mubr.msk.f32.mxu1 %vm507_vm0, %v2085_v20 }
 0x1df   : > { %v5250_v27 = vpop.eup %5249  ;;  %5269 = vrcp.f32 %v1899_v21  ;;  %v1901_v28 = vadd.f32 1.0, %v5248_v34  ;;  %v5978_v44 = vpop.f32.mrb[54].mxu0 }
 0x1e0   : > { %v5252_v29 = vpop.eup %5251  ;;  %5271 = vrcp.f32 %v1902_v24  ;;  %v4101_v60 = vmul.f32 -1.442695, %v5978_v44  ;;  %v5981_v50 = vpop.f32.mrb[55].mxu0  ;;  %v2088_v42 = vmul.f32 %v5250_v27, %v5908_v63 }
 0x1e1   : > { %v5254_v46 = vpop.eup %5253  ;;  %v2087_v33 = vmul.f32 %v5252_v29, %v5911_v3  ;;  %5273 = vrcp.f32 %v1901_v28  ;;  %4810 = vmatmul.mubr.msk.f32.gmra.mrb[38].mxu1 %vm507_vm0, %v2086_v54  ;;  %v4100_v47 = vmul.f32 -1.442695, %v5981_v50 }
 0x1e2   : > { %v5256_v0 = vpop.eup %5255  ;;  %v1904_v38 = vadd.f32 1.0, %v5254_v46  ;;  %5275 = vpow2.f32 %v4098_v53 }
 0x1e3   : > { %v5258_v61 = vpop.eup %5257  ;;  %v1903_v32 = vadd.f32 1.0, %v5256_v0  ;;  %5277 = vpow2.f32 %v4101_v60  ;;  %4812 = vmatprep.mubr.msk.f32.mxu1 %vm507_vm0, %v2087_v33  ;;  %v5988_v41 = vpop.f32.mrb[56].mxu0 }
 0x1e4   : > { %v5260_v1 = vpop.eup %5259  ;;  %5279 = vrcp.f32 %v1904_v38  ;;  %v4103_v3 = vmul.f32 -1.442695, %v5988_v41  ;;  %v5991_v62 = vpop.f32.mrb[57].mxu0  ;;  %v2090_v55 = vmul.f32 %v5258_v61, %v5917_v36 }
 0x1e5   : > { %v5262_v37 = vpop.eup %5261  ;;  %v2089_v11 = vmul.f32 %v5260_v1, %v5921_v17  ;;  %5281 = vrcp.f32 %v1903_v32  ;;  %4813 = vmatmul.mubr.msk.f32.gmra.mrb[40].mxu1 %vm507_vm0, %v2088_v42  ;;  %v4102_v5 = vmul.f32 -1.442695, %v5991_v62 }
 0x1e6   : > { %v5264_v49 = vpop.eup %5263  ;;  %v1906_v63 = vadd.f32 1.0, %v5262_v37  ;;  %5283 = vpow2.f32 %v4100_v47 }
 0x1e7   : > { %v5266_v43 = vpop.eup %5265  ;;  %v1905_v13 = vadd.f32 1.0, %v5264_v49  ;;  %5285 = vpow2.f32 %v4103_v3  ;;  %4815 = vmatprep.mubr.msk.f32.mxu1 %vm507_vm0, %v2089_v11  ;;  %v5998_v58 = vpop.f32.mrb[58].mxu0 }
 0x1e8   : > { %v5268_v7 = vpop.eup %5267  ;;  %5287 = vrcp.f32 %v1906_v63  ;;  %v4105_v17 = vmul.f32 -1.442695, %v5998_v58  ;;  %v6001_v12 = vpop.f32.mrb[59].mxu0  ;;  %v2092_v6 = vmul.f32 %v5266_v43, %v5927_v25 }
 0x1e9   : > { %v5270_v59 = vpop.eup %5269  ;;  %5289 = vrcp.f32 %v1905_v13  ;;  %v1908_v22 = vadd.f32 1.0, %v5268_v7  ;;  %4816 = vmatmul.mubr.msk.f32.gmra.mrb[42].mxu1 %vm507_vm0, %v2090_v55  ;;  %v4104_v23 = vmul.f32 -1.442695, %v6001_v12 }
 0x1ea   : > { %v5272_v36 = vpop.eup %5271  ;;  %v2091_v16 = vmul.f32 %v5270_v59, %v5931_v51  ;;  %5291 = vpow2.f32 %v4102_v5 }
 0x1eb   : > { %v5274_v4 = vpop.eup %5273  ;;  %5293 = vrcp.f32 %v1908_v22  ;;  %v6007_v26 = vpop.f32.mrb[60].mxu0  ;;  %v2094_v18 = vmul.f32 %v5272_v36, %v5937_v39 }
 0x1ec   : > { %v5276_v10 = vpop.eup %5275  ;;  %v2093_v19 = vmul.f32 %v5274_v4, %v5941_v8  ;;  %5295 = vpow2.f32 %v4105_v17  ;;  %4818 = vmatprep.mubr.msk.f32.mxu1 %vm507_vm0, %v2091_v16  ;;  %v4107_v56 = vmul.f32 -1.442695, %v6007_v26  ;;  %v6012_v48 = vpop.f32.mrb[61].mxu0 }
 0x1ed   : > { %v5278_v45 = vpop.eup %5277  ;;  %v1907_v30 = vadd.f32 1.0, %v5276_v10  ;;  %5297 = vpow2.f32 %v4104_v23  ;;  %4819 = vmatmul.mubr.msk.f32.gmra.mrb[44].mxu1 %vm507_vm0, %v2092_v6  ;;  %v4106_v25 = vmul.f32 -1.442695, %v6012_v48  ;;  %v2697_v10 = vld [vmem:[%s6056_s25 + $0x8] sm:$0xff] }
 0x1ee   : > { %v5280_v51 = vpop.eup %5279  ;;  %v1910_v14 = vadd.f32 1.0, %v5278_v45  ;;  %5299 = vpow2.f32 %v4107_v56  ;;  %4821 = vmatprep.mubr.msk.f32.mxu1 %vm507_vm0, %v2093_v19  ;;  %v2698_v19 = vld [vmem:[%s6056_s25 + $0x10] sm:$0xff]  ;;  %v2699_v56 = vld [vmem:[%s6056_s25 + $0x18] sm:$0xff]  ;;  %v2701_v45 = vld [vmem:[%s6056_s25 + $0x28] sm:$0xff] }
 0x1ef   : > { %v5282_v8 = vpop.eup %5281  ;;  %5301 = vrcp.f32 %v1907_v30  ;;  %v6018_v20 = vpop.f32.mrb[62].mxu0  ;;  %v2702_v30 = vld [vmem:[%s6056_s25 + $0x30] sm:$0xff] }
 0x1f0   : > { %v5284_v40 = vpop.eup %5283  ;;  %v2095_v31 = vmul.f32 %v5282_v8, %v5951_v57  ;;  %5303 = vrcp.f32 %v1910_v14  ;;  %v4109_v21 = vmul.f32 -1.442695, %v6018_v20  ;;  %v6022_v34 = vpop.f32.mrb[63].mxu0  ;;  %v2096_v57 = vmul.f32 %v5280_v51, %v5948_v52  ;;  %v2704_v51 = vld [vmem:[%s6056_s25 + $0x40] sm:$0xff]  ;;  %v2705_v14 = vld [vmem:[%s6056_s25 + $0x48] sm:$0xff]  ;;  %v2706_v8 = vld [vmem:[%s6056_s25 + $0x50] sm:$0xff] }
 0x1f1   : > { %v5286_v24 = vpop.eup %5285  ;;  %v1909_v53 = vadd.f32 1.0, %v5284_v40  ;;  %5305 = vpow2.f32 %v4106_v25  ;;  %4822 = vmatmul.mubr.msk.f32.gmra.mrb[46].mxu1 %vm507_vm0, %v2094_v18  ;;  %v4108_v27 = vmul.f32 -1.442695, %v6022_v34  ;;  %v2703_v25 = vld [vmem:[%s6056_s25 + $0x38] sm:$0xff]  ;;  %v2709_v40 = vld [vmem:[%s6056_s25 + $0x68] sm:$0xff] }
 0x1f2   : > { %v5288_v54 = vpop.eup %5287  ;;  %v1912_v39 = vadd.f32 1.0, %v5286_v24  ;;  %5307 = vpow2.f32 %v4109_v21  ;;  %4824 = vmatprep.mubr.msk.f32.mxu1 %vm507_vm0, %v2095_v31  ;;  %v2707_v18 = vld [vmem:[%s6056_s25 + $0x58] sm:$0xff]  ;;  %v2710_v31 = vld [vmem:[%s6056_s25 + $0x70] sm:$0xff]  ;;  %v2713_v24 = vld [vmem:[%s6056_s25 + $0x88] sm:$0xff] }
 0x1f3   : > { %v5290_v28 = vpop.eup %5289  ;;  %5309 = vrcp.f32 %v1909_v53  ;;  %v2098_v47 = vmul.f32 %v5288_v54, %v5958_v2  ;;  %v2711_v21 = vld [vmem:[%s6056_s25 + $0x78] sm:$0xff]  ;;  %v2714_v53 = vld [vmem:[%s6056_s25 + $0x90] sm:$0xff]  ;;  %v2716_v54 = vld [vmem:[%s6056_s25 + $0xa0] sm:$0xff] }
 0x1f4   : > { %v5292_v29 = vpop.eup %5291  ;;  %v2097_v60 = vmul.f32 %v5290_v28, %v5961_v9  ;;  %5311 = vpow2.f32 %v4108_v27  ;;  %v2715_v27 = vld [vmem:[%s6056_s25 + $0x98] sm:$0xff]  ;;  %v2718_v28 = vld [vmem:[%s6056_s25 + $0xb0] sm:$0xff] }
 0x1f5   : > { %v5294_v46 = vpop.eup %5293  ;;  %v1911_v33 = vadd.f32 1.0, %v5292_v29  ;;  %4825 = vmatmul.mubr.msk.f32.gmra.mrb[48].mxu1 %vm507_vm0, %v2096_v57  ;;  %5313 = vrcp.f32 %v1912_v39  ;;  %v2717_v39 = vld [vmem:[%s6056_s25 + $0xa8] sm:$0xff]  ;;  %v2719_v57 = vld [vmem:[%s6056_s25 + $0xb8] sm:$0xff]  ;;  %v2720_v29 = vld [vmem:[%s6056_s25 + $0xc0] sm:$0xff] }
 0x1f6   : > { %v5296_v0 = vpop.eup %5295  ;;  %4827 = vmatprep.mubr.msk.f32.mxu1 %vm507_vm0, %v2097_v60  ;;  %v2100_v11 = vmul.f32 %v5294_v46, %v5968_v15  ;;  %v2721_v60 = vld [vmem:[%s6056_s25 + $0xc8] sm:$0xff]  ;;  %v2722_v46 = vld [vmem:[%s6056_s25 + $0xd0] sm:$0xff] }
 0x1f7   : > { %v5298_v38 = vpop.eup %5297  ;;  %5315 = vrcp.f32 %v1911_v33  ;;  %v1914_v61 = vadd.f32 1.0, %v5296_v0  ;;  %v2723_v33 = vld [vmem:[%s6056_s25 + $0xd8] sm:$0xff]  ;;  %v2724_v0 = vld [vmem:[%s6056_s25 + $0xe0] sm:$0xff] }
 0x1f8   : > { %v5300_v42 = vpop.eup %5299  ;;  %v1913_v52 = vadd.f32 1.0, %v5298_v38  ;;  %v2725_v38 = vld [vmem:[%s6056_s25 + $0xe8] sm:$0xff] }
 0x1f9   : > { %v5302_v32 = vpop.eup %5301  ;;  %5317 = vrcp.f32 %v1914_v61  ;;  %v1916_v1 = vadd.f32 1.0, %v5300_v42  ;;  %4828 = vmatmul.mubr.msk.f32.gmra.mrb[50].mxu1 %vm507_vm0, %v2098_v47  ;;  %v2726_v47 = vld [vmem:[%s6056_s25 + $0xf0] sm:$0xff]  ;;  %v2727_v61 = vld [vmem:[%s6056_s25 + $0xf8] sm:$0xff]  ;;  %v2728_v42 = vld [vmem:[%s6056_s25 + $0x100] sm:$0xff] }
 0x1fa   : > { %v5304_v9 = vpop.eup %5303  ;;  %v2099_v3 = vmul.f32 %v5302_v32, %v5972_v35  ;;  %5319 = vrcp.f32 %v1913_v52  ;;  %v2729_v52 = vld [vmem:[%s6056_s25 + $0x108] sm:$0xff]  ;;  %v2730_v32 = vld [vmem:[%s6056_s25 + $0x110] sm:$0xff] }
 0x1fb   : > { %v5306_v37 = vpop.eup %5305  ;;  %5321 = vrcp.f32 %v1916_v1  ;;  %v2102_v13 = vmul.f32 %v5304_v9, %v5978_v44  ;;  %v2731_v1 = vld [vmem:[%s6056_s25 + $0x118] sm:$0xff]  ;;  %v2732_v9 = vld [vmem:[%s6056_s25 + $0x120] sm:$0xff] }
 0x1fc   : > { %v5308_v49 = vpop.eup %5307  ;;  %v1915_v63 = vadd.f32 1.0, %v5306_v37  ;;  %4830 = vmatprep.mubr.msk.f32.mxu1 %vm507_vm0, %v2099_v3  ;;  %v2733_v3 = vld [vmem:[%s6056_s25 + $0x128] sm:$0xff]  ;;  %v2734_v37 = vld [vmem:[%s6056_s25 + $0x130] sm:$0xff] }
 0x1fd   : > { %v5310_v2 = vpop.eup %5309  ;;  %v1918_v5 = vadd.f32 1.0, %v5308_v49  ;;  %4831 = vmatmul.mubr.msk.f32.gmra.mrb[52].mxu1 %vm507_vm0, %v2100_v11  ;;  %v2735_v11 = vld [vmem:[%s6056_s25 + $0x138] sm:$0xff]  ;;  %v2736_v49 = vld [vmem:[%s6056_s25 + $0x140] sm:$0xff] }
 0x1fe   : > { %v2101_v43 = vmul.f32 %v5310_v2, %v5981_v50  ;;  %5323 = vrcp.f32 %v1915_v63  ;;  %v5312_v55 = vpop.eup %5311  ;;  %v2737_v63 = vld [vmem:[%s6056_s25 + $0x148] sm:$0xff]  ;;  %v2738_v2 = vld [vmem:[%s6056_s25 + $0x150] sm:$0xff] }
 0x1ff   : > { %v5314_v35 = vpop.eup %5313  ;;  %v1917_v7 = vadd.f32 1.0, %v5312_v55  ;;  %5325 = vrcp.f32 %v1918_v5  ;;  %v2739_v55 = vld [vmem:[%s6056_s25 + $0x158] sm:$0xff] }
 0x200   : > { %4833 = vmatprep.mubr.msk.f32.mxu1 %vm507_vm0, %v2101_v43  ;;  %v2104_v22 = vmul.f32 %v5314_v35, %v5988_v41 }
 0x201   : > { %v5316_v15 = vpop.eup %5315  ;;  %4834 = vmatmul.mubr.msk.f32.gmra.mrb[54].mxu1 %vm507_vm0, %v2102_v13  ;;  %5327 = vrcp.f32 %v1917_v7  ;;  %v2740_v13 = vld [vmem:[%s6056_s25 + $0x160] sm:$0xff] }
 0x202   : > { %v2103_v17 = vmul.f32 %v5316_v15, %v5991_v62  ;;  %v2741_v15 = vld [vmem:[%s6056_s25 + $0x168] sm:$0xff] }
 0x203   : > { %v5318_v59 = vpop.eup %5317 }
 0x204   : > { %v5320_v50 = vpop.eup %5319  ;;  %4836 = vmatprep.mubr.msk.f32.mxu1 %vm507_vm0, %v2103_v17  ;;  %v2106_v36 = vmul.f32 %v5318_v59, %v5998_v58  ;;  %v2742_v17 = vld [vmem:[%s6056_s25 + $0x170] sm:$0xff] }
 0x205   : > { %v2105_v44 = vmul.f32 %v5320_v50, %v6001_v12  ;;  %4837 = vmatmul.mubr.msk.f32.gmra.mrb[56].mxu1 %vm507_vm0, %v2104_v22  ;;  %v5322_v23 = vpop.eup %5321  ;;  %v2743_v50 = vld [vmem:[%s6056_s25 + $0x178] sm:$0xff] }
 0x206   : > { %v2108_v41 = vmul.f32 %v5322_v23, %v6007_v26  ;;  %v2696_v26 = vld [vmem:[%s6056_s25] sm:$0xff]  ;;  %v2745_v23 = vld [vmem:[%s6056_s25 + $0x188] sm:$0xff] }
 0x207   : > { %4839 = vmatprep.mubr.msk.f32.mxu1 %vm507_vm0, %v2105_v44  ;;  %v2744_v44 = vld [vmem:[%s6056_s25 + $0x180] sm:$0xff] }
 0x208   : > { %v5324_v16 = vpop.eup %5323 }
 0x209   : > { %v2107_v62 = vmul.f32 %v5324_v16, %v6012_v48  ;;  %4840 = vmatmul.mubr.msk.f32.gmra.mrb[58].mxu1 %vm507_vm0, %v2106_v36  ;;  %v5326_v4 = vpop.eup %5325  ;;  %v2700_v48 = vld [vmem:[%s6056_s25 + $0x20] sm:$0xff]  ;;  %v2746_v16 = vld [vmem:[%s6056_s25 + $0x190] sm:$0xff] }
 0x20a   : > { %v2110_v12 = vmul.f32 %v5326_v4, %v6018_v20  ;;  %v2708_v20 = vld [vmem:[%s6056_s25 + $0x60] sm:$0xff]  ;;  %v2747_v4 = vld [vmem:[%s6056_s25 + $0x198] sm:$0xff] }
 0x20b   : > { %4842 = vmatprep.mubr.msk.f32.mxu1 %vm507_vm0, %v2107_v62  ;;  %v5328_v6 = vpop.eup %5327 }
 0x20c   : > { %v2109_v58 = vmul.f32 %v5328_v6, %v6022_v34  ;;  %v2712_v34 = vld [vmem:[%s6056_s25 + $0x80] sm:$0xff] }
 0x20d   : > { %4843 = vmatmul.mubr.msk.f32.gmra.mrb[60].mxu1 %vm507_vm0, %v2108_v41  ;;  %v2748_v6 = vld [vmem:[%s6056_s25 + $0x1a0] sm:$0xff] }
 0x20e   : > { %4845 = vmatprep.mubr.msk.f32.mxu1 %vm507_vm0, %v2109_v58 }
 0x211   : > { %4846 = vmatmul.mubr.msk.f32.gmra.mrb[62].mxu1 %vm507_vm0, %v2110_v12  ;;  %v2749_v12 = vld [vmem:[%s6056_s25 + $0x1a8] sm:$0xff] }
 0x212   : > { %4856 = vmatprep.mubr.msk.f32.mxu1 %vm1085_vm1, %v2696_v26 }
 0x215   : > { %4857 = vmatmul.mubr.msk.f32.vlgmr.msra.gmra.mrb[64].mxu1 %vm1085_vm1, %v2697_v10  ;;  %v2750_v10 = vld [vmem:[%s6056_s25 + $0x1b0] sm:$0xff] }
 0x216   : > { %4859 = vmatprep.mubr.msk.f32.mxu1 %vm1085_vm1, %v2698_v19 }
 0x219   : > { %4860 = vmatmul.mubr.msk.f32.gmra.mrb[66].mxu1 %vm1085_vm1, %v2699_v56  ;;  %v2751_v56 = vld [vmem:[%s6056_s25 + $0x1b8] sm:$0xff] }
 0x21a   : > { %4862 = vmatprep.mubr.msk.f32.mxu1 %vm1085_vm1, %v2700_v48 }
 0x21d   : > { %4863 = vmatmul.mubr.msk.f32.gmra.mrb[68].mxu1 %vm1085_vm1, %v2701_v45  ;;  %v2752_v45 = vld [vmem:[%s6056_s25 + $0x1c0] sm:$0xff] }
 0x21e   : > { %4865 = vmatprep.mubr.msk.f32.mxu1 %vm1085_vm1, %v2702_v30 }
 0x221   : > { %4866 = vmatmul.mubr.msk.f32.gmra.mrb[70].mxu1 %vm1085_vm1, %v2703_v25  ;;  %v2753_v25 = vld [vmem:[%s6056_s25 + $0x1c8] sm:$0xff] }
 0x222   : > { %4868 = vmatprep.mubr.msk.f32.mxu1 %vm1085_vm1, %v2704_v51 }
 0x225   : > { %4869 = vmatmul.mubr.msk.f32.gmra.mrb[72].mxu1 %vm1085_vm1, %v2705_v14  ;;  %v2754_v14 = vld [vmem:[%s6056_s25 + $0x1d0] sm:$0xff] }
 0x226   : > { %4871 = vmatprep.mubr.msk.f32.mxu1 %vm1085_vm1, %v2706_v8 }
 0x229   : > { %4872 = vmatmul.mubr.msk.f32.gmra.mrb[74].mxu1 %vm1085_vm1, %v2707_v18  ;;  %v2755_v18 = vld [vmem:[%s6056_s25 + $0x1d8] sm:$0xff] }
 0x22a   : > { %4874 = vmatprep.mubr.msk.f32.mxu1 %vm1085_vm1, %v2708_v20 }
 0x22d   : > { %4875 = vmatmul.mubr.msk.f32.gmra.mrb[76].mxu1 %vm1085_vm1, %v2709_v40  ;;  %v2756_v40 = vld [vmem:[%s6056_s25 + $0x1e0] sm:$0xff] }
 0x22e   : > { %4877 = vmatprep.mubr.msk.f32.mxu1 %vm1085_vm1, %v2710_v31 }
 0x231   : > { %4878 = vmatmul.mubr.msk.f32.gmra.mrb[78].mxu1 %vm1085_vm1, %v2711_v21  ;;  %v2757_v21 = vld [vmem:[%s6056_s25 + $0x1e8] sm:$0xff] }
 0x232   : > { %4880 = vmatprep.mubr.msk.f32.mxu1 %vm1085_vm1, %v2712_v34  ;;  %v2758_v34 = vld [vmem:[%s6056_s25 + $0x1f0] sm:$0xff] }
 0x235   : > { %4881 = vmatmul.mubr.msk.f32.gmra.mrb[80].mxu1 %vm1085_vm1, %v2713_v24 }
 0x236   : > { %4883 = vmatprep.mubr.msk.f32.mxu1 %vm1085_vm1, %v2714_v53 }
 0x239   : > { %4884 = vmatmul.mubr.msk.f32.gmra.mrb[82].mxu1 %vm1085_vm1, %v2715_v27  ;;  %v2759_v27 = vld [vmem:[%s6056_s25 + $0x1f8] sm:$0xff] }
 0x23a   : > { %4886 = vmatprep.mubr.msk.f32.mxu1 %vm1085_vm1, %v2716_v54 }
 0x23d   : > { %4887 = vmatmul.mubr.msk.f32.gmra.mrb[84].mxu1 %vm1085_vm1, %v2717_v39 }
 0x23e   : > { %4889 = vmatprep.mubr.msk.f32.mxu1 %vm1085_vm1, %v2718_v28 }
 0x241   : > { %4890 = vmatmul.mubr.msk.f32.gmra.mrb[86].mxu1 %vm1085_vm1, %v2719_v57 }
 0x242   : > { %4892 = vmatprep.mubr.msk.f32.mxu1 %vm1085_vm1, %v2720_v29 }
 0x245   : > { %4893 = vmatmul.mubr.msk.f32.gmra.mrb[88].mxu1 %vm1085_vm1, %v2721_v60 }
 0x246   : > { %4895 = vmatprep.mubr.msk.f32.mxu1 %vm1085_vm1, %v2722_v46 }
 0x249   : > { %4896 = vmatmul.mubr.msk.f32.gmra.mrb[90].mxu1 %vm1085_vm1, %v2723_v33 }
 0x24a   : > { %4898 = vmatprep.mubr.msk.f32.mxu1 %vm1085_vm1, %v2724_v0 }
 0x24d   : > { %4899 = vmatmul.mubr.msk.f32.gmra.mrb[92].mxu1 %vm1085_vm1, %v2725_v38 }
 0x24e   : > { %4901 = vmatprep.mubr.msk.f32.mxu1 %vm1085_vm1, %v2726_v47 }
 0x251   : > { %4902 = vmatmul.mubr.msk.f32.gmra.mrb[94].mxu1 %vm1085_vm1, %v2727_v61 }
 0x252   : > { %4904 = vmatprep.mubr.msk.f32.mxu1 %vm1085_vm1, %v2728_v42 }
 0x255   : > { %4905 = vmatmul.mubr.msk.f32.gmra.mrb[96].mxu1 %vm1085_vm1, %v2729_v52 }
 0x256   : > { %4907 = vmatprep.mubr.msk.f32.mxu1 %vm1085_vm1, %v2730_v32 }
 0x259   : > { %4908 = vmatmul.mubr.msk.f32.gmra.mrb[98].mxu1 %vm1085_vm1, %v2731_v1 }
 0x25a   : > { %4910 = vmatprep.mubr.msk.f32.mxu1 %vm1085_vm1, %v2732_v9 }
 0x25d   : > { %4911 = vmatmul.mubr.msk.f32.gmra.mrb[100].mxu1 %vm1085_vm1, %v2733_v3 }
 0x25e   : > { %4913 = vmatprep.mubr.msk.f32.mxu1 %vm1085_vm1, %v2734_v37 }
 0x261   : > { %4914 = vmatmul.mubr.msk.f32.gmra.mrb[102].mxu1 %vm1085_vm1, %v2735_v11 }
 0x262   : > { %4916 = vmatprep.mubr.msk.f32.mxu1 %vm1085_vm1, %v2736_v49 }
 0x265   : > { %4917 = vmatmul.mubr.msk.f32.gmra.mrb[104].mxu1 %vm1085_vm1, %v2737_v63  ;;  %v6148_v5 = vpop.f32.mrb[0].mxu1 }
 0x266   : > { %4919 = vmatprep.mubr.msk.f32.mxu1 %vm1085_vm1, %v2738_v2  ;;  %3535 = vrot.lane.b32.xlu0 %v6148_v5, %s5337_s26  ;;  %v6153_v43 = vpop.f32.mrb[1].mxu1 }
 0x269   : > { %4920 = vmatmul.mubr.msk.f32.gmra.mrb[106].mxu1 %vm1085_vm1, %v2739_v55  ;;  %v6158_v35 = vpop.f32.mrb[2].mxu1 }
 0x26a   : > { %4922 = vmatprep.mubr.msk.f32.mxu1 %vm1085_vm1, %v2740_v13  ;;  %3533 = vrot.lane.b32.xlu0 %v6153_v43, %s5337_s26  ;;  %v6163_v7 = vpop.f32.mrb[3].mxu1 }
 0x26b   : > { %3539 = vrot.lane.b32.xlu1 %v6158_v35, %s5337_s26 }
 0x26d   : > { %4923 = vmatmul.mubr.msk.f32.gmra.mrb[108].mxu1 %vm1085_vm1, %v2741_v15  ;;  %v6170_v59 = vpop.f32.mrb[4].mxu1 }
 0x26e   : > { %4925 = vmatprep.mubr.msk.f32.mxu1 %vm1085_vm1, %v2742_v17  ;;  %v6173_v22 = vpop.f32.mrb[5].mxu1 }
 0x26f   : > { %3537 = vrot.lane.b32.xlu1 %v6163_v7, %s5337_s26  ;;  %3541 = vrot.lane.b32.xlu0 %v6173_v22, %s5337_s26 }
 0x271   : > { %4926 = vmatmul.mubr.msk.f32.gmra.mrb[110].mxu1 %vm1085_vm1, %v2743_v50 }
 0x272   : > { %4928 = vmatprep.mubr.msk.f32.mxu1 %vm1085_vm1, %v2744_v44 }
 0x273   : > { %v6184_v36 = vpop.f32.mrb[6].mxu1  ;;  %3543 = vrot.lane.b32.xlu1 %v6170_v59, %s5337_s26 }
 0x274   : > { %v6189_v62 = vpop.f32.mrb[7].mxu1 }
 0x275   : > { %4929 = vmatmul.mubr.msk.f32.gmra.mrb[112].mxu1 %vm1085_vm1, %v2745_v23  ;;  %3545 = vrot.lane.b32.xlu0 %v6189_v62, %s5337_s26 }
 0x276   : > { %4931 = vmatprep.mubr.msk.f32.mxu1 %vm1085_vm1, %v2746_v16 }
 0x277   : > { %v6196_v41 = vpop.f32.mrb[8].mxu1  ;;  %3547 = vrot.lane.b32.xlu1 %v6184_v36, %s5337_s26 }
 0x278   : > { %v6201_v58 = vpop.f32.mrb[9].mxu1 }
 0x279   : > { %4932 = vmatmul.mubr.msk.f32.gmra.mrb[114].mxu1 %vm1085_vm1, %v2747_v4  ;;  %3549 = vrot.lane.b32.xlu0 %v6201_v58, %s5337_s26 }
 0x27a   : > { %4934 = vmatprep.mubr.msk.f32.mxu1 %vm1085_vm1, %v2748_v6 }
 0x27b   : > { %v6208_v26 = vpop.f32.mrb[10].mxu1  ;;  %3551 = vrot.lane.b32.xlu1 %v6196_v41, %s5337_s26 }
 0x27c   : > { %v6213_v19 = vpop.f32.mrb[11].mxu1 }
 0x27d   : > { %4935 = vmatmul.mubr.msk.f32.gmra.mrb[116].mxu1 %vm1085_vm1, %v2749_v12  ;;  %3553 = vrot.lane.b32.xlu0 %v6213_v19, %s5337_s26 }
 0x27e   : > { %4937 = vmatprep.mubr.msk.f32.mxu1 %vm1085_vm1, %v2750_v10 }
 0x27f   : > { %v6220_v48 = vpop.f32.mrb[12].mxu1  ;;  %3555 = vrot.lane.b32.xlu1 %v6208_v26, %s5337_s26 }
 0x280   : > { %v6225_v30 = vpop.f32.mrb[13].mxu1 }
 0x281   : > { %4938 = vmatmul.mubr.msk.f32.gmra.mrb[118].mxu1 %vm1085_vm1, %v2751_v56  ;;  %3557 = vrot.lane.b32.xlu0 %v6225_v30, %s5337_s26 }
 0x282   : > { %4940 = vmatprep.mubr.msk.f32.mxu1 %vm1085_vm1, %v2752_v45 }
 0x283   : > { %v6232_v51 = vpop.f32.mrb[14].mxu1  ;;  %3559 = vrot.lane.b32.xlu1 %v6220_v48, %s5337_s26 }
 0x284   : > { %v6237_v8 = vpop.f32.mrb[15].mxu1 }
 0x285   : > { %4941 = vmatmul.mubr.msk.f32.gmra.mrb[120].mxu1 %vm1085_vm1, %v2753_v25  ;;  %3561 = vrot.lane.b32.xlu0 %v6237_v8, %s5337_s26 }
 0x286   : > { %4943 = vmatprep.mubr.msk.f32.mxu1 %vm1085_vm1, %v2754_v14 }
 0x287   : > { %v6244_v20 = vpop.f32.mrb[16].mxu1  ;;  %3563 = vrot.lane.b32.xlu1 %v6232_v51, %s5337_s26 }
 0x288   : > { %v6249_v31 = vpop.f32.mrb[17].mxu1 }
 0x289   : > { %4944 = vmatmul.mubr.msk.f32.gmra.mrb[122].mxu1 %vm1085_vm1, %v2755_v18  ;;  %3565 = vrot.lane.b32.xlu0 %v6249_v31, %s5337_s26 }
 0x28a   : > { %4946 = vmatprep.mubr.msk.f32.mxu1 %vm1085_vm1, %v2756_v40 }
 0x28b   : > { %3567 = vrot.lane.b32.xlu1 %v6244_v20, %s5337_s26 }
 0x28c   : > { %v6259_v24 = vpop.f32.mrb[18].mxu1 }
 0x28d   : > { %v6261_v53 = vpop.f32.mrb[19].mxu1  ;;  %4947 = vmatmul.mubr.msk.f32.gmra.mrb[124].mxu1 %vm1085_vm1, %v2757_v21 }
 0x28e   : > { %3569 = vrot.lane.b32.xlu0 %v6261_v53, %s5337_s26  ;;  %4949 = vmatprep.mubr.msk.f32.mxu1 %vm1085_vm1, %v2758_v34 }
 0x28f   : > { %3571 = vrot.lane.b32.xlu1 %v6259_v24, %s5337_s26 }
 0x290   : > { %v6270_v54 = vpop.f32.mrb[20].mxu1 }
 0x291   : > { %v6272_v39 = vpop.f32.mrb[21].mxu1  ;;  %4950 = vmatmul.mubr.msk.f32.gmra.mrb[126].mxu1 %vm1085_vm1, %v2759_v27 }
 0x292   : > { %3573 = vrot.lane.b32.xlu0 %v6272_v39, %s5337_s26 }
 0x293   : > { %3575 = vrot.lane.b32.xlu1 %v6270_v54, %s5337_s26 }
 0x294   : > { %v6279_v28 = vpop.f32.mrb[22].mxu1 }
 0x295   : > { %v6281_v57 = vpop.f32.mrb[23].mxu1 }
 0x296   : > { %3577 = vrot.lane.b32.xlu0 %v6281_v57, %s5337_s26 }
 0x297   : > { %3579 = vrot.lane.b32.xlu1 %v6279_v28, %s5337_s26 }
 0x298   : > { %v6287_v29 = vpop.f32.mrb[24].mxu1 }
 0x299   : > { %v6289_v60 = vpop.f32.mrb[25].mxu1 }
 0x29a   : > { %3581 = vrot.lane.b32.xlu0 %v6289_v60, %s5337_s26 }
 0x29b   : > { %3583 = vrot.lane.b32.xlu1 %v6287_v29, %s5337_s26 }
 0x29c   : > { %v6295_v46 = vpop.f32.mrb[26].mxu1 }
 0x29d   : > { %v6297_v33 = vpop.f32.mrb[27].mxu1 }
 0x29e   : > { %3585 = vrot.lane.b32.xlu0 %v6297_v33, %s5337_s26 }
 0x29f   : > { %3587 = vrot.lane.b32.xlu1 %v6295_v46, %s5337_s26 }
 0x2a0   : > { %v6303_v0 = vpop.f32.mrb[28].mxu1 }
 0x2a1   : > { %v6305_v38 = vpop.f32.mrb[29].mxu1 }
 0x2a2   : > { %3589 = vrot.lane.b32.xlu0 %v6305_v38, %s5337_s26 }
 0x2a3   : > { %3591 = vrot.lane.b32.xlu1 %v6303_v0, %s5337_s26 }
 0x2a4   : > { %v6311_v47 = vpop.f32.mrb[30].mxu1 }
 0x2a5   : > { %v6313_v61 = vpop.f32.mrb[31].mxu1 }
 0x2a6   : > { %3593 = vrot.lane.b32.xlu0 %v6313_v61, %s5337_s26 }
 0x2a7   : > { %3595 = vrot.lane.b32.xlu1 %v6311_v47, %s5337_s26 }
 0x2a8   : > { %v6319_v42 = vpop.f32.mrb[32].mxu1 }
 0x2a9   : > { %v6321_v52 = vpop.f32.mrb[33].mxu1 }
 0x2aa   : > { %3597 = vrot.lane.b32.xlu0 %v6321_v52, %s5337_s26 }
 0x2ab   : > { %3599 = vrot.lane.b32.xlu1 %v6319_v42, %s5337_s26 }
 0x2ac   : > { %v6327_v32 = vpop.f32.mrb[34].mxu1 }
 0x2ad   : > { %v6329_v1 = vpop.f32.mrb[35].mxu1 }
 0x2ae   : > { %3601 = vrot.lane.b32.xlu0 %v6329_v1, %s5337_s26 }
 0x2af   : > { %3603 = vrot.lane.b32.xlu1 %v6327_v32, %s5337_s26 }
 0x2b0   : > { %v6335_v9 = vpop.f32.mrb[36].mxu1 }
 0x2b1   : > { %v6337_v3 = vpop.f32.mrb[37].mxu1 }
 0x2b2   : > { %3605 = vrot.lane.b32.xlu0 %v6337_v3, %s5337_s26 }
 0x2b3   : > { %3607 = vrot.lane.b32.xlu1 %v6335_v9, %s5337_s26 }
 0x2b4   : > { %v6343_v37 = vpop.f32.mrb[38].mxu1 }
 0x2b5   : > { %v6345_v11 = vpop.f32.mrb[39].mxu1 }
 0x2b6   : > { %3609 = vrot.lane.b32.xlu0 %v6345_v11, %s5337_s26 }
 0x2b7   : > { %3611 = vrot.lane.b32.xlu1 %v6343_v37, %s5337_s26 }
 0x2b8   : > { %v6351_v49 = vpop.f32.mrb[40].mxu1 }
 0x2b9   : > { %v6353_v63 = vpop.f32.mrb[41].mxu1 }
 0x2ba   : > { %3613 = vrot.lane.b32.xlu0 %v6353_v63, %s5337_s26 }
 0x2bb   : > { %3615 = vrot.lane.b32.xlu1 %v6351_v49, %s5337_s26 }
 0x2bc   : > { %v6359_v2 = vpop.f32.mrb[42].mxu1 }
 0x2bd   : > { %v6361_v55 = vpop.f32.mrb[43].mxu1 }
 0x2be   : > { %3617 = vrot.lane.b32.xlu0 %v6361_v55, %s5337_s26 }
 0x2bf   : > { %3619 = vrot.lane.b32.xlu1 %v6359_v2, %s5337_s26 }
 0x2c0   : > { %v6367_v13 = vpop.f32.mrb[44].mxu1 }
 0x2c1   : > { %v6369_v15 = vpop.f32.mrb[45].mxu1 }
 0x2c2   : > { %3621 = vrot.lane.b32.xlu0 %v6369_v15, %s5337_s26 }
 0x2c3   : > { %3623 = vrot.lane.b32.xlu1 %v6367_v13, %s5337_s26 }
 0x2c4   : > { %v6375_v17 = vpop.f32.mrb[46].mxu1 }
 0x2c5   : > { %v6377_v50 = vpop.f32.mrb[47].mxu1 }
 0x2c6   : > { %3625 = vrot.lane.b32.xlu0 %v6377_v50, %s5337_s26 }
 0x2c7   : > { %3627 = vrot.lane.b32.xlu1 %v6375_v17, %s5337_s26 }
 0x2c8   : > { %v6383_v44 = vpop.f32.mrb[48].mxu1 }
 0x2c9   : > { %v6385_v23 = vpop.f32.mrb[49].mxu1 }
 0x2ca   : > { %3629 = vrot.lane.b32.xlu0 %v6385_v23, %s5337_s26 }
 0x2cb   : > { %3631 = vrot.lane.b32.xlu1 %v6383_v44, %s5337_s26 }
 0x2cc   : > { %v6391_v16 = vpop.f32.mrb[50].mxu1 }
 0x2cd   : > { %v6393_v4 = vpop.f32.mrb[51].mxu1 }
 0x2ce   : > { %3633 = vrot.lane.b32.xlu0 %v6393_v4, %s5337_s26 }
 0x2cf   : > { %3635 = vrot.lane.b32.xlu1 %v6391_v16, %s5337_s26 }
 0x2d0   : > { %v6399_v6 = vpop.f32.mrb[52].mxu1 }
 0x2d1   : > { %v6401_v12 = vpop.f32.mrb[53].mxu1 }
 0x2d2   : > { %3637 = vrot.lane.b32.xlu0 %v6401_v12, %s5337_s26 }
 0x2d3   : > { %3639 = vrot.lane.b32.xlu1 %v6399_v6, %s5337_s26 }
 0x2d4   : > { %v6407_v10 = vpop.f32.mrb[54].mxu1 }
 0x2d5   : > { %v6409_v56 = vpop.f32.mrb[55].mxu1 }
 0x2d6   : > { %3641 = vrot.lane.b32.xlu0 %v6409_v56, %s5337_s26 }
 0x2d7   : > { %3643 = vrot.lane.b32.xlu1 %v6407_v10, %s5337_s26 }
 0x2d8   : > { %v6421_v45 = vpop.f32.mrb[56].mxu1  ;;  %v3536_v25 = vpop.permute.xlu0 %3535 }
 0x2d9   : > { %6799 = vst [vmem:[#allocation2_spill] sm:$0xff] %v6421_v45  ;;  %v6423_v14 = vpop.f32.mrb[57].mxu1  ;;  %3726 = vst.msk [vmem:[%s6417_s30 + $0x8] sm:$0xff] %vm507_vm0, %v3536_v25 }
 0x2da   : > { %6800 = vst [vmem:[#allocation3_spill] sm:$0xff] %v6423_v14  ;;  %3645 = vrot.lane.b32.xlu0 %v6423_v14, %s5337_s26 }
 0x2db   : > { %3647 = vrot.lane.b32.xlu1 %v6421_v45, %s5337_s26 }
 0x2dc   : > { %v6431_v18 = vpop.f32.mrb[58].mxu1  ;;  %v3534_v40 = vpop.permute.xlu0 %3533 }
 0x2dd   : > { %6801 = vst [vmem:[#allocation4_spill] sm:$0xff] %v6431_v18  ;;  %v6433_v21 = vpop.f32.mrb[59].mxu1  ;;  %3725 = vst.msk [vmem:[%s6417_s30] sm:$0xff] %vm507_vm0, %v3534_v40  ;;  %v3540_v34 = vpop.permute.xlu1 %3539 }
 0x2de   : > { %6802 = vst [vmem:[#allocation5_spill] sm:$0xff] %v6433_v21  ;;  %3649 = vrot.lane.b32.xlu0 %v6433_v21, %s5337_s26  ;;  %3728 = vst.msk [vmem:[%s6417_s30 + $0x18] sm:$0xff] %vm507_vm0, %v3540_v34 }
 0x2df   : > { %3651 = vrot.lane.b32.xlu1 %v6431_v18, %s5337_s26 }
 0x2e0   : > { %v6443_v27 = vpop.f32.mrb[60].mxu1 }
 0x2e1   : > { %6803 = vst [vmem:[#allocation6_spill] sm:$0xff] %v6443_v27  ;;  %v6445_v25 = vpop.f32.mrb[61].mxu1  ;;  %v3538_v14 = vpop.permute.xlu1 %3537 }
 0x2e2   : > { %6804 = vst [vmem:[#allocation7_spill] sm:$0xff] %v6445_v25  ;;  %3653 = vrot.lane.b32.xlu0 %v6445_v25, %s5337_s26  ;;  %3727 = vst.msk [vmem:[%s6417_s30 + $0x10] sm:$0xff] %vm507_vm0, %v3538_v14  ;;  %v3542_v40 = vpop.permute.xlu0 %3541 }
 0x2e3   : > { %3729 = vst.msk [vmem:[%s6417_s30 + $0x20] sm:$0xff] %vm507_vm0, %v3542_v40  ;;  %3655 = vrot.lane.b32.xlu1 %v6443_v27, %s5337_s26 }
 0x2e4   : > { %v6455_v34 = vpop.f32.mrb[62].mxu1 }
 0x2e5   : > { %6805 = vst [vmem:[#allocation8_spill] sm:$0xff] %v6455_v34  ;;  %v6457_v21 = vpop.f32.mrb[63].mxu1  ;;  %v3544_v18 = vpop.permute.xlu1 %3543 }
 0x2e6   : > { %6806 = vst [vmem:[#allocation9_spill] sm:$0xff] %v6457_v21  ;;  %3657 = vrot.lane.b32.xlu0 %v6457_v21, %s5337_s26  ;;  %3730 = vst.msk [vmem:[%s6417_s30 + $0x28] sm:$0xff] %vm507_vm0, %v3544_v18 }
 0x2e7   : > { %v3546_v25 = vpop.permute.xlu0 %3545  ;;  %3659 = vrot.lane.b32.xlu1 %v6455_v34, %s5337_s26 }
 0x2e8   : > { %3731 = vst.msk [vmem:[%s6417_s30 + $0x30] sm:$0xff] %vm507_vm0, %v3546_v25  ;;  %v4858_v14 = vpop.f32.mrb[64].mxu1 }
 0x2e9   : > { %v3342_v40 = vadd.f32 %v4858_v14, %v6148_v5  ;;  %v3022_v21 = vpop.f32.mrb[65].mxu1  ;;  %v3548_v18 = vpop.permute.xlu1 %3547 }
 0x2ea   : > { %v3341_v34 = vadd.f32 %v3022_v21, %v6153_v43  ;;  %3732 = vst.msk [vmem:[%s6417_s30 + $0x38] sm:$0xff] %vm507_vm0, %v3548_v18 }
 0x2eb   : > { %3406 = vst.msk [vmem:[%s6471_s11 + $0x8] sm:$0xff] %vm507_vm0, %v3342_v40  ;;  %v3550_v25 = vpop.permute.xlu0 %3549 }
 0x2ec   : > { %3405 = vst.msk [vmem:[%s6471_s11] sm:$0xff] %vm507_vm0, %v3341_v34  ;;  %3733 = vst.msk [vmem:[%s6417_s30 + $0x40] sm:$0xff] %vm507_vm0, %v3550_v25  ;;  %v4861_v27 = vpop.f32.mrb[66].mxu1 }
 0x2ed   : > { %v3344_v5 = vadd.f32 %v4861_v27, %v6158_v35  ;;  %v3032_v14 = vpop.f32.mrb[67].mxu1  ;;  %v3552_v45 = vpop.permute.xlu1 %3551 }
 0x2ee   : > { %v3343_v43 = vadd.f32 %v3032_v14, %v6163_v7  ;;  %3734 = vst.msk [vmem:[%s6417_s30 + $0x48] sm:$0xff] %vm507_vm0, %v3552_v45 }
 0x2ef   : > { %3408 = vst.msk [vmem:[%s6471_s11 + $0x18] sm:$0xff] %vm507_vm0, %v3344_v5  ;;  %v3554_v21 = vpop.permute.xlu0 %3553 }
 0x2f0   : > { %3407 = vst.msk [vmem:[%s6471_s11 + $0x10] sm:$0xff] %vm507_vm0, %v3343_v43  ;;  %3735 = vst.msk [vmem:[%s6417_s30 + $0x50] sm:$0xff] %vm507_vm0, %v3554_v21  ;;  %v4864_v34 = vpop.f32.mrb[68].mxu1 }
 0x2f1   : > { %v3346_v35 = vadd.f32 %v4864_v34, %v6170_v59  ;;  %v3042_v27 = vpop.f32.mrb[69].mxu1  ;;  %v3556_v40 = vpop.permute.xlu1 %3555 }
 0x2f2   : > { %v3345_v7 = vadd.f32 %v3042_v27, %v6173_v22  ;;  %3736 = vst.msk [vmem:[%s6417_s30 + $0x58] sm:$0xff] %vm507_vm0, %v3556_v40 }
 0x2f3   : > { %3410 = vst.msk [vmem:[%s6471_s11 + $0x28] sm:$0xff] %vm507_vm0, %v3346_v35  ;;  %v3558_v45 = vpop.permute.xlu0 %3557 }
 0x2f4   : > { %3409 = vst.msk [vmem:[%s6471_s11 + $0x20] sm:$0xff] %vm507_vm0, %v3345_v7  ;;  %3737 = vst.msk [vmem:[%s6417_s30 + $0x60] sm:$0xff] %vm507_vm0, %v3558_v45  ;;  %v4867_v18 = vpop.f32.mrb[70].mxu1 }
 0x2f5   : > { %v3348_v59 = vadd.f32 %v4867_v18, %v6184_v36  ;;  %v3052_v25 = vpop.f32.mrb[71].mxu1  ;;  %v3560_v5 = vpop.permute.xlu1 %3559 }
 0x2f6   : > { %v3347_v22 = vadd.f32 %v3052_v25, %v6189_v62  ;;  %3738 = vst.msk [vmem:[%s6417_s30 + $0x68] sm:$0xff] %vm507_vm0, %v3560_v5 }
 0x2f7   : > { %3412 = vst.msk [vmem:[%s6471_s11 + $0x38] sm:$0xff] %vm507_vm0, %v3348_v59  ;;  %v3562_v14 = vpop.permute.xlu0 %3561 }
 0x2f8   : > { %3411 = vst.msk [vmem:[%s6471_s11 + $0x30] sm:$0xff] %vm507_vm0, %v3347_v22  ;;  %3739 = vst.msk [vmem:[%s6417_s30 + $0x70] sm:$0xff] %vm507_vm0, %v3562_v14  ;;  %v4870_v43 = vpop.f32.mrb[72].mxu1 }
 0x2f9   : > { %v3350_v36 = vadd.f32 %v4870_v43, %v6196_v41  ;;  %v3062_v21 = vpop.f32.mrb[73].mxu1  ;;  %v3564_v34 = vpop.permute.xlu1 %3563 }
 0x2fa   : > { %v3349_v35 = vadd.f32 %v3062_v21, %v6201_v58  ;;  %3740 = vst.msk [vmem:[%s6417_s30 + $0x78] sm:$0xff] %vm507_vm0, %v3564_v34 }
 0x2fb   : > { %3414 = vst.msk [vmem:[%s6471_s11 + $0x48] sm:$0xff] %vm507_vm0, %v3350_v36  ;;  %v3566_v62 = vpop.permute.xlu0 %3565 }
 0x2fc   : > { %3413 = vst.msk [vmem:[%s6471_s11 + $0x40] sm:$0xff] %vm507_vm0, %v3349_v35  ;;  %3741 = vst.msk [vmem:[%s6417_s30 + $0x80] sm:$0xff] %vm507_vm0, %v3566_v62  ;;  %v4873_v27 = vpop.f32.mrb[74].mxu1 }
 0x2fd   : > { %v3352_v41 = vadd.f32 %v4873_v27, %v6208_v26  ;;  %v3072_v40 = vpop.f32.mrb[75].mxu1  ;;  %v3568_v7 = vpop.permute.xlu1 %3567 }
 0x2fe   : > { %v3351_v58 = vadd.f32 %v3072_v40, %v6213_v19  ;;  %3742 = vst.msk [vmem:[%s6417_s30 + $0x88] sm:$0xff] %vm507_vm0, %v3568_v7 }
 0x2ff   : > { %3416 = vst.msk [vmem:[%s6471_s11 + $0x58] sm:$0xff] %vm507_vm0, %v3352_v41 }
 0x300   : > { %3415 = vst.msk [vmem:[%s6471_s11 + $0x50] sm:$0xff] %vm507_vm0, %v3351_v58  ;;  %v3570_v45 = vpop.permute.xlu0 %3569  ;;  %v4876_v18 = vpop.f32.mrb[76].mxu1 }
 0x301   : > { %3743 = vst.msk [vmem:[%s6417_s30 + $0x90] sm:$0xff] %vm507_vm0, %v3570_v45  ;;  %v3354_v26 = vadd.f32 %v4876_v18, %v6220_v48  ;;  %v3082_v59 = vpop.f32.mrb[77].mxu1  ;;  %v3572_v25 = vpop.permute.xlu1 %3571 }
 0x302   : > { %v3353_v19 = vadd.f32 %v3082_v59, %v6225_v30  ;;  %3744 = vst.msk [vmem:[%s6417_s30 + $0x98] sm:$0xff] %vm507_vm0, %v3572_v25 }
 0x303   : > { %3418 = vst.msk [vmem:[%s6471_s11 + $0x68] sm:$0xff] %vm507_vm0, %v3354_v26 }
 0x304   : > { %3417 = vst.msk [vmem:[%s6471_s11 + $0x60] sm:$0xff] %vm507_vm0, %v3353_v19  ;;  %v3574_v5 = vpop.permute.xlu0 %3573  ;;  %v4879_v22 = vpop.f32.mrb[78].mxu1 }
 0x305   : > { %3745 = vst.msk [vmem:[%s6417_s30 + $0xa0] sm:$0xff] %vm507_vm0, %v3574_v5  ;;  %v3356_v48 = vadd.f32 %v4879_v22, %v6232_v51  ;;  %v3092_v14 = vpop.f32.mrb[79].mxu1  ;;  %v3576_v43 = vpop.permute.xlu1 %3575 }
 0x306   : > { %v3355_v30 = vadd.f32 %v3092_v14, %v6237_v8  ;;  %3746 = vst.msk [vmem:[%s6417_s30 + $0xa8] sm:$0xff] %vm507_vm0, %v3576_v43 }
 0x307   : > { %3420 = vst.msk [vmem:[%s6471_s11 + $0x78] sm:$0xff] %vm507_vm0, %v3356_v48 }
 0x308   : > { %3419 = vst.msk [vmem:[%s6471_s11 + $0x70] sm:$0xff] %vm507_vm0, %v3355_v30  ;;  %v3578_v36 = vpop.permute.xlu0 %3577  ;;  %v4882_v21 = vpop.f32.mrb[80].mxu1 }
 0x309   : > { %3747 = vst.msk [vmem:[%s6417_s30 + $0xb0] sm:$0xff] %vm507_vm0, %v3578_v36  ;;  %v3358_v51 = vadd.f32 %v4882_v21, %v6244_v20  ;;  %v3102_v34 = vpop.f32.mrb[81].mxu1  ;;  %v3580_v35 = vpop.permute.xlu1 %3579 }
 0x30a   : > { %v3357_v8 = vadd.f32 %v3102_v34, %v6249_v31  ;;  %3748 = vst.msk [vmem:[%s6417_s30 + $0xb8] sm:$0xff] %vm507_vm0, %v3580_v35 }
 0x30b   : > { %3422 = vst.msk [vmem:[%s6471_s11 + $0x88] sm:$0xff] %vm507_vm0, %v3358_v51 }
 0x30c   : > { %3421 = vst.msk [vmem:[%s6471_s11 + $0x80] sm:$0xff] %vm507_vm0, %v3357_v8  ;;  %v3582_v62 = vpop.permute.xlu0 %3581  ;;  %v4885_v27 = vpop.f32.mrb[82].mxu1 }
 0x30d   : > { %3749 = vst.msk [vmem:[%s6417_s30 + $0xc0] sm:$0xff] %vm507_vm0, %v3582_v62  ;;  %v3360_v20 = vadd.f32 %v4885_v27, %v6259_v24  ;;  %v3112_v41 = vpop.f32.mrb[83].mxu1  ;;  %v3584_v40 = vpop.permute.xlu1 %3583 }
 0x30e   : > { %v3359_v31 = vadd.f32 %v3112_v41, %v6261_v53  ;;  %3750 = vst.msk [vmem:[%s6417_s30 + $0xc8] sm:$0xff] %vm507_vm0, %v3584_v40 }
 0x30f   : > { %3424 = vst.msk [vmem:[%s6471_s11 + $0x98] sm:$0xff] %vm507_vm0, %v3360_v20 }
 0x310   : > { %3423 = vst.msk [vmem:[%s6471_s11 + $0x90] sm:$0xff] %vm507_vm0, %v3359_v31  ;;  %v3586_v7 = vpop.permute.xlu0 %3585  ;;  %v4888_v58 = vpop.f32.mrb[84].mxu1 }
 0x311   : > { %3751 = vst.msk [vmem:[%s6417_s30 + $0xd0] sm:$0xff] %vm507_vm0, %v3586_v7  ;;  %v3362_v24 = vadd.f32 %v4888_v58, %v6270_v54  ;;  %v3122_v45 = vpop.f32.mrb[85].mxu1  ;;  %v3588_v18 = vpop.permute.xlu1 %3587 }
 0x312   : > { %v3361_v53 = vadd.f32 %v3122_v45, %v6272_v39  ;;  %3752 = vst.msk [vmem:[%s6417_s30 + $0xd8] sm:$0xff] %vm507_vm0, %v3588_v18 }
 0x313   : > { %3426 = vst.msk [vmem:[%s6471_s11 + $0xa8] sm:$0xff] %vm507_vm0, %v3362_v24 }
 0x314   : > { %3425 = vst.msk [vmem:[%s6471_s11 + $0xa0] sm:$0xff] %vm507_vm0, %v3361_v53  ;;  %v3590_v26 = vpop.permute.xlu0 %3589  ;;  %v4891_v59 = vpop.f32.mrb[86].mxu1 }
 0x315   : > { %3753 = vst.msk [vmem:[%s6417_s30 + $0xe0] sm:$0xff] %vm507_vm0, %v3590_v26  ;;  %v3364_v54 = vadd.f32 %v4891_v59, %v6279_v28  ;;  %v3132_v25 = vpop.f32.mrb[87].mxu1  ;;  %v3592_v19 = vpop.permute.xlu1 %3591 }
 0x316   : > { %v3363_v39 = vadd.f32 %v3132_v25, %v6281_v57  ;;  %3754 = vst.msk [vmem:[%s6417_s30 + $0xe8] sm:$0xff] %vm507_vm0, %v3592_v19 }
 0x317   : > { %3428 = vst.msk [vmem:[%s6471_s11 + $0xb8] sm:$0xff] %vm507_vm0, %v3364_v54 }
 0x318   : > { %3427 = vst.msk [vmem:[%s6471_s11 + $0xb0] sm:$0xff] %vm507_vm0, %v3363_v39  ;;  %v3594_v5 = vpop.permute.xlu0 %3593  ;;  %v4894_v22 = vpop.f32.mrb[88].mxu1 }
 0x319   : > { %3755 = vst.msk [vmem:[%s6417_s30 + $0xf0] sm:$0xff] %vm507_vm0, %v3594_v5  ;;  %v3366_v28 = vadd.f32 %v4894_v22, %v6287_v29  ;;  %v3142_v48 = vpop.f32.mrb[89].mxu1  ;;  %v3596_v14 = vpop.permute.xlu1 %3595 }
 0x31a   : > { %v3365_v57 = vadd.f32 %v3142_v48, %v6289_v60  ;;  %3756 = vst.msk [vmem:[%s6417_s30 + $0xf8] sm:$0xff] %vm507_vm0, %v3596_v14 }
 0x31b   : > { %3430 = vst.msk [vmem:[%s6471_s11 + $0xc8] sm:$0xff] %vm507_vm0, %v3366_v28 }
 0x31c   : > { %3429 = vst.msk [vmem:[%s6471_s11 + $0xc0] sm:$0xff] %vm507_vm0, %v3365_v57  ;;  %v3598_v43 = vpop.permute.xlu0 %3597  ;;  %v4897_v30 = vpop.f32.mrb[90].mxu1 }
 0x31d   : > { %3757 = vst.msk [vmem:[%s6417_s30 + $0x100] sm:$0xff] %vm507_vm0, %v3598_v43  ;;  %v3368_v29 = vadd.f32 %v4897_v30, %v6295_v46  ;;  %v3152_v36 = vpop.f32.mrb[91].mxu1  ;;  %v3600_v21 = vpop.permute.xlu1 %3599 }
 0x31e   : > { %v3367_v60 = vadd.f32 %v3152_v36, %v6297_v33  ;;  %3758 = vst.msk [vmem:[%s6417_s30 + $0x108] sm:$0xff] %vm507_vm0, %v3600_v21 }
 0x31f   : > { %3432 = vst.msk [vmem:[%s6471_s11 + $0xd8] sm:$0xff] %vm507_vm0, %v3368_v29 }
 0x320   : > { %3431 = vst.msk [vmem:[%s6471_s11 + $0xd0] sm:$0xff] %vm507_vm0, %v3367_v60  ;;  %v3602_v51 = vpop.permute.xlu0 %3601  ;;  %v4900_v34 = vpop.f32.mrb[92].mxu1 }
 0x321   : > { %3759 = vst.msk [vmem:[%s6417_s30 + $0x110] sm:$0xff] %vm507_vm0, %v3602_v51  ;;  %v3370_v46 = vadd.f32 %v4900_v34, %v6303_v0  ;;  %v3162_v35 = vpop.f32.mrb[93].mxu1  ;;  %v3604_v8 = vpop.permute.xlu1 %3603 }
 0x322   : > { %v3369_v33 = vadd.f32 %v3162_v35, %v6305_v38  ;;  %3760 = vst.msk [vmem:[%s6417_s30 + $0x118] sm:$0xff] %vm507_vm0, %v3604_v8 }
 0x323   : > { %3434 = vst.msk [vmem:[%s6471_s11 + $0xe8] sm:$0xff] %vm507_vm0, %v3370_v46 }
 0x324   : > { %3433 = vst.msk [vmem:[%s6471_s11 + $0xe0] sm:$0xff] %vm507_vm0, %v3369_v33  ;;  %v3606_v62 = vpop.permute.xlu0 %3605  ;;  %v4903_v27 = vpop.f32.mrb[94].mxu1 }
 0x325   : > { %3761 = vst.msk [vmem:[%s6417_s30 + $0x120] sm:$0xff] %vm507_vm0, %v3606_v62  ;;  %v3372_v0 = vadd.f32 %v4903_v27, %v6311_v47  ;;  %v3172_v20 = vpop.f32.mrb[95].mxu1  ;;  %v3608_v41 = vpop.permute.xlu1 %3607 }
 0x326   : > { %v3371_v38 = vadd.f32 %v3172_v20, %v6313_v61  ;;  %3762 = vst.msk [vmem:[%s6417_s30 + $0x128] sm:$0xff] %vm507_vm0, %v3608_v41 }
 0x327   : > { %3436 = vst.msk [vmem:[%s6471_s11 + $0xf8] sm:$0xff] %vm507_vm0, %v3372_v0 }
 0x328   : > { %3435 = vst.msk [vmem:[%s6471_s11 + $0xf0] sm:$0xff] %vm507_vm0, %v3371_v38  ;;  %v3610_v40 = vpop.permute.xlu0 %3609  ;;  %v4906_v31 = vpop.f32.mrb[96].mxu1 }
 0x329   : > { %3763 = vst.msk [vmem:[%s6417_s30 + $0x130] sm:$0xff] %vm507_vm0, %v3610_v40  ;;  %v3374_v47 = vadd.f32 %v4906_v31, %v6319_v42  ;;  %v3182_v7 = vpop.f32.mrb[97].mxu1  ;;  %v3612_v58 = vpop.permute.xlu1 %3611 }
 0x32a   : > { %v3373_v61 = vadd.f32 %v3182_v7, %v6321_v52  ;;  %3764 = vst.msk [vmem:[%s6417_s30 + $0x138] sm:$0xff] %vm507_vm0, %v3612_v58 }
 0x32b   : > { %3438 = vst.msk [vmem:[%s6471_s11 + $0x108] sm:$0xff] %vm507_vm0, %v3374_v47 }
 0x32c   : > { %3437 = vst.msk [vmem:[%s6471_s11 + $0x100] sm:$0xff] %vm507_vm0, %v3373_v61  ;;  %v3614_v24 = vpop.permute.xlu0 %3613  ;;  %v4909_v45 = vpop.f32.mrb[98].mxu1 }
 0x32d   : > { %3765 = vst.msk [vmem:[%s6417_s30 + $0x140] sm:$0xff] %vm507_vm0, %v3614_v24  ;;  %v3376_v42 = vadd.f32 %v4909_v45, %v6327_v32  ;;  %v3192_v18 = vpop.f32.mrb[99].mxu1  ;;  %v3616_v53 = vpop.permute.xlu1 %3615 }
 0x32e   : > { %v3375_v52 = vadd.f32 %v3192_v18, %v6329_v1  ;;  %3766 = vst.msk [vmem:[%s6417_s30 + $0x148] sm:$0xff] %vm507_vm0, %v3616_v53 }
 0x32f   : > { %3440 = vst.msk [vmem:[%s6471_s11 + $0x118] sm:$0xff] %vm507_vm0, %v3376_v42 }
 0x330   : > { %3439 = vst.msk [vmem:[%s6471_s11 + $0x110] sm:$0xff] %vm507_vm0, %v3375_v52  ;;  %v3618_v26 = vpop.permute.xlu0 %3617  ;;  %v4912_v59 = vpop.f32.mrb[100].mxu1 }
 0x331   : > { %3767 = vst.msk [vmem:[%s6417_s30 + $0x150] sm:$0xff] %vm507_vm0, %v3618_v26  ;;  %v3378_v32 = vadd.f32 %v4912_v59, %v6335_v9  ;;  %v3202_v54 = vpop.f32.mrb[101].mxu1  ;;  %v3620_v25 = vpop.permute.xlu1 %3619  ;;  %v6807_v26 = vld [vmem:[#allocation2_spill] sm:$0xff] }
 0x332   : > { %v3377_v1 = vadd.f32 %v3202_v54, %v6337_v3  ;;  %3768 = vst.msk [vmem:[%s6417_s30 + $0x158] sm:$0xff] %vm507_vm0, %v3620_v25  ;;  %v6808_v54 = vld [vmem:[#allocation3_spill] sm:$0xff] }
 0x333   : > { %3442 = vst.msk [vmem:[%s6471_s11 + $0x128] sm:$0xff] %vm507_vm0, %v3378_v32 }
 0x334   : > { %3441 = vst.msk [vmem:[%s6471_s11 + $0x120] sm:$0xff] %vm507_vm0, %v3377_v1  ;;  %v3622_v19 = vpop.permute.xlu0 %3621  ;;  %v4915_v39 = vpop.f32.mrb[102].mxu1  ;;  %v6809_v1 = vld [vmem:[#allocation4_spill] sm:$0xff] }
 0x335   : > { %3769 = vst.msk [vmem:[%s6417_s30 + $0x160] sm:$0xff] %vm507_vm0, %v3622_v19  ;;  %v3380_v9 = vadd.f32 %v4915_v39, %v6343_v37  ;;  %v3212_v5 = vpop.f32.mrb[103].mxu1  ;;  %v3624_v22 = vpop.permute.xlu1 %3623 }
 0x336   : > { %v3379_v3 = vadd.f32 %v3212_v5, %v6345_v11  ;;  %3770 = vst.msk [vmem:[%s6417_s30 + $0x168] sm:$0xff] %vm507_vm0, %v3624_v22 }
 0x337   : > { %3444 = vst.msk [vmem:[%s6471_s11 + $0x138] sm:$0xff] %vm507_vm0, %v3380_v9  ;;  %v6810_v9 = vld [vmem:[#allocation5_spill] sm:$0xff] }
 0x338   : > { %3443 = vst.msk [vmem:[%s6471_s11 + $0x130] sm:$0xff] %vm507_vm0, %v3379_v3  ;;  %v3626_v28 = vpop.permute.xlu0 %3625  ;;  %v4918_v48 = vpop.f32.mrb[104].mxu1  ;;  %v6811_v3 = vld [vmem:[#allocation6_spill] sm:$0xff] }
 0x339   : > { %3771 = vst.msk [vmem:[%s6417_s30 + $0x170] sm:$0xff] %vm507_vm0, %v3626_v28  ;;  %v3382_v37 = vadd.f32 %v4918_v48, %v6351_v49  ;;  %v3222_v14 = vpop.f32.mrb[105].mxu1  ;;  %v3628_v57 = vpop.permute.xlu1 %3627 }
 0x33a   : > { %v3381_v11 = vadd.f32 %v3222_v14, %v6353_v63  ;;  %3772 = vst.msk [vmem:[%s6417_s30 + $0x178] sm:$0xff] %vm507_vm0, %v3628_v57 }
 0x33b   : > { %3446 = vst.msk [vmem:[%s6471_s11 + $0x148] sm:$0xff] %vm507_vm0, %v3382_v37  ;;  %v6812_v37 = vld [vmem:[#allocation7_spill] sm:$0xff] }
 0x33c   : > { %3445 = vst.msk [vmem:[%s6471_s11 + $0x140] sm:$0xff] %vm507_vm0, %v3381_v11  ;;  %v3630_v43 = vpop.permute.xlu0 %3629  ;;  %v4921_v30 = vpop.f32.mrb[106].mxu1  ;;  %v6813_v11 = vld [vmem:[#allocation8_spill] sm:$0xff] }
 0x33d   : > { %3773 = vst.msk [vmem:[%s6417_s30 + $0x180] sm:$0xff] %vm507_vm0, %v3630_v43  ;;  %v3384_v49 = vadd.f32 %v4921_v30, %v6359_v2  ;;  %v3232_v29 = vpop.f32.mrb[107].mxu1  ;;  %v3632_v36 = vpop.permute.xlu1 %3631 }
 0x33e   : > { %v3383_v63 = vadd.f32 %v3232_v29, %v6361_v55  ;;  %3774 = vst.msk [vmem:[%s6417_s30 + $0x188] sm:$0xff] %vm507_vm0, %v3632_v36 }
 0x33f   : > { %3448 = vst.msk [vmem:[%s6471_s11 + $0x158] sm:$0xff] %vm507_vm0, %v3384_v49  ;;  %v6814_v49 = vld [vmem:[#allocation9_spill] sm:$0xff] }
 0x340   : > { %3447 = vst.msk [vmem:[%s6471_s11 + $0x150] sm:$0xff] %vm507_vm0, %v3383_v63  ;;  %v3634_v21 = vpop.permute.xlu0 %3633  ;;  %v4924_v60 = vpop.f32.mrb[108].mxu1 }
 0x341   : > { %3775 = vst.msk [vmem:[%s6417_s30 + $0x190] sm:$0xff] %vm507_vm0, %v3634_v21  ;;  %v3386_v2 = vadd.f32 %v4924_v60, %v6367_v13  ;;  %v3242_v51 = vpop.f32.mrb[109].mxu1  ;;  %v3636_v34 = vpop.permute.xlu1 %3635 }
 0x342   : > { %v3385_v55 = vadd.f32 %v3242_v51, %v6369_v15  ;;  %3776 = vst.msk [vmem:[%s6417_s30 + $0x198] sm:$0xff] %vm507_vm0, %v3636_v34 }
 0x343   : > { %3450 = vst.msk [vmem:[%s6471_s11 + $0x168] sm:$0xff] %vm507_vm0, %v3386_v2 }
 0x344   : > { %3449 = vst.msk [vmem:[%s6471_s11 + $0x160] sm:$0xff] %vm507_vm0, %v3385_v55  ;;  %v3638_v46 = vpop.permute.xlu0 %3637  ;;  %v4927_v35 = vpop.f32.mrb[110].mxu1 }
 0x345   : > { %3777 = vst.msk [vmem:[%s6417_s30 + $0x1a0] sm:$0xff] %vm507_vm0, %v3638_v46  ;;  %v3388_v13 = vadd.f32 %v4927_v35, %v6375_v17  ;;  %v3252_v8 = vpop.f32.mrb[111].mxu1  ;;  %v3640_v33 = vpop.permute.xlu1 %3639 }
 0x346   : > { %v3387_v15 = vadd.f32 %v3252_v8, %v6377_v50  ;;  %3778 = vst.msk [vmem:[%s6417_s30 + $0x1a8] sm:$0xff] %vm507_vm0, %v3640_v33 }
 0x347   : > { %3452 = vst.msk [vmem:[%s6471_s11 + $0x178] sm:$0xff] %vm507_vm0, %v3388_v13 }
 0x348   : > { %3451 = vst.msk [vmem:[%s6471_s11 + $0x170] sm:$0xff] %vm507_vm0, %v3387_v15  ;;  %v3642_v62 = vpop.permute.xlu0 %3641  ;;  %v4930_v27 = vpop.f32.mrb[112].mxu1 }
 0x349   : > { %3779 = vst.msk [vmem:[%s6417_s30 + $0x1b0] sm:$0xff] %vm507_vm0, %v3642_v62  ;;  %v3390_v17 = vadd.f32 %v4930_v27, %v6383_v44  ;;  %v3262_v0 = vpop.f32.mrb[113].mxu1  ;;  %v3644_v20 = vpop.permute.xlu1 %3643 }
 0x34a   : > { %v3389_v50 = vadd.f32 %v3262_v0, %v6385_v23  ;;  %3780 = vst.msk [vmem:[%s6417_s30 + $0x1b8] sm:$0xff] %vm507_vm0, %v3644_v20 }
 0x34b   : > { %3454 = vst.msk [vmem:[%s6471_s11 + $0x188] sm:$0xff] %vm507_vm0, %v3390_v17 }
 0x34c   : > { %3453 = vst.msk [vmem:[%s6471_s11 + $0x180] sm:$0xff] %vm507_vm0, %v3389_v50  ;;  %v3646_v41 = vpop.permute.xlu0 %3645  ;;  %v4933_v38 = vpop.f32.mrb[114].mxu1 }
 0x34d   : > { %3781 = vst.msk [vmem:[%s6417_s30 + $0x1c0] sm:$0xff] %vm507_vm0, %v3646_v41  ;;  %v3392_v44 = vadd.f32 %v4933_v38, %v6391_v16  ;;  %v3272_v40 = vpop.f32.mrb[115].mxu1  ;;  %v3648_v31 = vpop.permute.xlu1 %3647 }
 0x34e   : > { %v3391_v23 = vadd.f32 %v3272_v40, %v6393_v4  ;;  %3782 = vst.msk [vmem:[%s6417_s30 + $0x1c8] sm:$0xff] %vm507_vm0, %v3648_v31 }
 0x34f   : > { %3456 = vst.msk [vmem:[%s6471_s11 + $0x198] sm:$0xff] %vm507_vm0, %v3392_v44 }
 0x350   : > { %3455 = vst.msk [vmem:[%s6471_s11 + $0x190] sm:$0xff] %vm507_vm0, %v3391_v23  ;;  %v3650_v47 = vpop.permute.xlu0 %3649  ;;  %v4936_v7 = vpop.f32.mrb[116].mxu1 }
 0x351   : > { %3783 = vst.msk [vmem:[%s6417_s30 + $0x1d0] sm:$0xff] %vm507_vm0, %v3650_v47  ;;  %v3394_v16 = vadd.f32 %v4936_v7, %v6399_v6  ;;  %v3282_v58 = vpop.f32.mrb[117].mxu1  ;;  %v3652_v61 = vpop.permute.xlu1 %3651 }
 0x352   : > { %v3393_v4 = vadd.f32 %v3282_v58, %v6401_v12  ;;  %3784 = vst.msk [vmem:[%s6417_s30 + $0x1d8] sm:$0xff] %vm507_vm0, %v3652_v61 }
 0x353   : > { %3458 = vst.msk [vmem:[%s6471_s11 + $0x1a8] sm:$0xff] %vm507_vm0, %v3394_v16 }
 0x354   : > { %3457 = vst.msk [vmem:[%s6471_s11 + $0x1a0] sm:$0xff] %vm507_vm0, %v3393_v4  ;;  %v3654_v24 = vpop.permute.xlu0 %3653  ;;  %v4939_v45 = vpop.f32.mrb[118].mxu1 }
 0x355   : > { %3785 = vst.msk [vmem:[%s6417_s30 + $0x1e0] sm:$0xff] %vm507_vm0, %v3654_v24  ;;  %v3396_v6 = vadd.f32 %v4939_v45, %v6407_v10  ;;  %v3292_v42 = vpop.f32.mrb[119].mxu1  ;;  %v3656_v18 = vpop.permute.xlu1 %3655 }
 0x356   : > { %v3395_v12 = vadd.f32 %v3292_v42, %v6409_v56  ;;  %3786 = vst.msk [vmem:[%s6417_s30 + $0x1e8] sm:$0xff] %vm507_vm0, %v3656_v18 }
 0x357   : > { %3460 = vst.msk [vmem:[%s6471_s11 + $0x1b8] sm:$0xff] %vm507_vm0, %v3396_v6 }
 0x358   : > { %3459 = vst.msk [vmem:[%s6471_s11 + $0x1b0] sm:$0xff] %vm507_vm0, %v3395_v12  ;;  %v3658_v53 = vpop.permute.xlu0 %3657  ;;  %v4942_v52 = vpop.f32.mrb[120].mxu1 }
 0x359   : > { %3787 = vst.msk [vmem:[%s6417_s30 + $0x1f0] sm:$0xff] %vm507_vm0, %v3658_v53  ;;  %v3398_v59 = vadd.f32 %v4942_v52, %v6807_v26  ;;  %v3302_v10 = vpop.f32.mrb[121].mxu1  ;;  %v3660_v32 = vpop.permute.xlu1 %3659 }
 0x35a   : > { %v3397_v56 = vadd.f32 %v3302_v10, %v6808_v54  ;;  %3788 = vst.msk [vmem:[%s6417_s30 + $0x1f8] sm:$0xff] %vm507_vm0, %v3660_v32 }
 0x35b   : > { %3462 = vst.msk [vmem:[%s6471_s11 + $0x1c8] sm:$0xff] %vm507_vm0, %v3398_v59 }
 0x35c   : > { %3461 = vst.msk [vmem:[%s6471_s11 + $0x1c0] sm:$0xff] %vm507_vm0, %v3397_v56  ;;  %v4945_v25 = vpop.f32.mrb[122].mxu1 }
 0x35d   : > { %v3400_v19 = vadd.f32 %v4945_v25, %v6809_v1  ;;  %v3312_v39 = vpop.f32.mrb[123].mxu1 }
 0x35e   : > { %v3399_v5 = vadd.f32 %v3312_v39, %v6810_v9 }
 0x35f   : > { %3464 = vst.msk [vmem:[%s6471_s11 + $0x1d8] sm:$0xff] %vm507_vm0, %v3400_v19 }
 0x360   : > { %3463 = vst.msk [vmem:[%s6471_s11 + $0x1d0] sm:$0xff] %vm507_vm0, %v3399_v5  ;;  %v4948_v22 = vpop.f32.mrb[124].mxu1 }
 0x361   : > { %v3402_v28 = vadd.f32 %v4948_v22, %v6811_v3  ;;  %v3322_v48 = vpop.f32.mrb[125].mxu1 }
 0x362   : > { %v3401_v14 = vadd.f32 %v3322_v48, %v6812_v37 }
 0x363   : > { %3466 = vst.msk [vmem:[%s6471_s11 + $0x1e8] sm:$0xff] %vm507_vm0, %v3402_v28 }
 0x364   : > { %3465 = vst.msk [vmem:[%s6471_s11 + $0x1e0] sm:$0xff] %vm507_vm0, %v3401_v14  ;;  %v4951_v57 = vpop.f32.mrb[126].mxu1 }
 0x365   : > { %v3404_v43 = vadd.f32 %v4951_v57, %v6813_v11  ;;  %v3332_v30 = vpop.f32.mrb[127].mxu1 }
 0x366   : > { %v3403_v29 = vadd.f32 %v3332_v30, %v6814_v49 }
 0x367   : > { %3468 = vst.msk [vmem:[%s6471_s11 + $0x1f8] sm:$0xff] %vm507_vm0, %v3404_v43 }
 0x368   : > { %3467 = vst.msk [vmem:[%s6471_s11 + $0x1f0] sm:$0xff] %vm507_vm0, %v3403_v29 }
 0x369 PF: > { %s19_s27 = sadd.s32 1, %s5335_s27  }
 0x36a   : > { %p16_p4 = scmp.ge.s32.totalorder %s19_s27, 4  }
 0x36c   :  { %18 = sbr.rel (!%p16_p4) target bundleno = 1 (0x1), region = 96 }

</bundles_post_ra>
